<compile_context>
chip_gen: v5e
topology: v5e:2x2
jax: 0.10.0
libtpu: 0.0.40
codegen_flags: <defaults>
</compile_context>

<pallas_src>
import functools

import jax
import jax.numpy as jnp
from jax.experimental import pallas as pl
from jax.experimental.pallas import tpu as pltpu


def _round_up(x, m):
    return ((x + m - 1) // m) * m


def _cdiv(a, b):
    return -(-a // b)


def _vmem_budget_bytes():
    """Per-TensorCore VMEM budget with ~8 MiB headroom (generation-aware)."""
    cap = 64 * 1024 * 1024            # conservative default = v7x per-TC VMEM
    try:
        info = pltpu.get_tpu_info()
        cap = int(getattr(info, "vmem_capacity_bytes", cap))
    except Exception:
        pass
    return max(cap - 8 * 1024 * 1024, 16 * 1024 * 1024)


def _choose_h_pad(h):
    """Pad H to a lane multiple; use a 256-multiple (full v6e/v7x MXU width)
    only when the extra padding is nearly free (<= 1/16 extra columns)."""
    h128 = _round_up(h, 128)
    h256 = _round_up(h, 256)
    if h256 != h128 and (h256 - h128) * 16 <= h128:
        return h256
    return h128


def _choose_tile_m(m, h_pad, avail_bytes):
    """Pick tile_m so double-buffered bf16 activation tiles fit the leftover
    VMEM, rows prefer >= 256 (full MXU), and the parallel grid axis gets an
    even block count >= 2 (balances v7x's two TensorCores) whenever M allows."""
    m8 = _round_up(max(m, 1), 8)
    per_row = 2 * 3 * h_pad * 2            # 2x buffers x (s, t, fused) x bf16
    tile_cap = max(8, min(2048, (avail_bytes // max(per_row, 1)) // 8 * 8))
    if tile_cap >= 256:
        tile_cap = (tile_cap // 256) * 256
    nb_target = max(2, _cdiv(m8, tile_cap))
    if nb_target % 2:
        nb_target += 1
    tile = max(8, min(tile_cap, _round_up(_cdiv(m8, nb_target), 8)))
    m_pad = _round_up(m8, tile)
    return tile, m_pad // tile, m_pad


def _kd_kernel(s_ref, t_ref, wp_ref, bp_ref, wfs_ref, wft_ref, bf_ref,
               fused_ref, part_ref, *, inv_t, m_actual, h_actual, tile_m):
    i = pl.program_id(0)

    s_bf = s_ref[...]                           # [tile_m, H_pad] bf16
    t_bf = t_ref[...]                           # [tile_m, H_pad] bf16
    s = s_bf.astype(jnp.float32)
    t = t_bf.astype(jnp.float32)
    h_pad = s.shape[1]

    # Validity masks for zero-padded rows (M) and columns (H).
    col_ids = jax.lax.broadcasted_iota(jnp.int32, (1, h_pad), 1)
    col_valid = col_ids < h_actual                                   # [1, H_pad]
    row_ids = jax.lax.broadcasted_iota(jnp.int32, (tile_m, 1), 0) + i * tile_m
    row_valid = (row_ids < m_actual).astype(jnp.float32)             # [tile_m, 1]

    # student_projection: Linear(H, H)  (bf16 x bf16 -> f32 MXU accumulation)
    proj = jnp.dot(s_bf, wp_ref[...],
                   preferred_element_type=jnp.float32) + bp_ref[...]

    neg = jnp.float32(-1e30)

    # log_softmax(student_proj / T, axis=-1); padded columns pushed to -1e30.
    z = jnp.where(col_valid, proj * inv_t, neg)
    z = z - jnp.max(z, axis=-1, keepdims=True)
    lse_s = jnp.log(jnp.sum(jnp.exp(z), axis=-1, keepdims=True))
    log_p_s = z - lse_s

    # softmax / log_softmax(teacher / T) in log space (no log(p) -> no NaN).
    u = jnp.where(col_valid, t * inv_t, neg)
    u = u - jnp.max(u, axis=-1, keepdims=True)
    eu = jnp.exp(u)
    sum_eu = jnp.sum(eu, axis=-1, keepdims=True)
    log_p_t = u - jnp.log(sum_eu)
    p_t = eu / sum_eu          # exact division (approx recip biases the KL)

    # KL partial sum. Padded columns contribute 0 (p_t == 0 there); padded rows
    # are masked explicitly.
    kl_rows = jnp.sum(p_t * (log_p_t - log_p_s), axis=-1, keepdims=True)
    kl_sum = jnp.sum(kl_rows * row_valid)

    # MSE partial sum (inputs are zero-padded, so padded entries contribute 0).
    diff = s - t
    sq_sum = jnp.sum(diff * diff)

    # knowledge_fusion(concat([student_proj, teacher_logits], -1)) split into
    # two matmuls to avoid an in-kernel concat.
    fused = (jnp.dot(proj.astype(jnp.bfloat16), wfs_ref[...],
                     preferred_element_type=jnp.float32)
             + jnp.dot(t_bf, wft_ref[...], preferred_element_type=jnp.float32)
             + bf_ref[...])
    fused_ref[...] = fused.astype(fused_ref.dtype)

    # Per-block loss partials: lane 0 carries the value; sublane 0 = KL sum,
    # sublane 1 = squared-error sum.
    sub = jax.lax.broadcasted_iota(jnp.int32, (1, 2, 128), 1)
    part_ref[...] = jnp.where(sub == 0, kl_sum, sq_sum)


def prepare_params(params, hidden_size):
    """One-time host-side prep: transpose to [in, out], split the fusion
    weight, pad H, cast matmul weights to bf16."""
    h = hidden_size
    h_pad = _choose_h_pad(h)

    wp = jnp.asarray(params["wp"], jnp.float32).T            # [H, H] (in, out)
    wf_full = jnp.asarray(params["wf"], jnp.float32).T       # [2H, H]
    wf_s = wf_full[:h, :]                                     # acts on student_proj
    wf_t = wf_full[h:, :]                                     # acts on teacher_logits

    def pad_w(w):
        return jnp.pad(w, ((0, h_pad - w.shape[0]), (0, h_pad - w.shape[1])))

    def pad_b(b):
        b = jnp.asarray(b, jnp.float32).reshape(1, -1)
        return jnp.pad(b, ((0, 0), (0, h_pad - b.shape[1])))

    return {
        "wp": pad_w(wp).astype(jnp.bfloat16),
        "bp": pad_b(params["bp"]),
        "wf_s": pad_w(wf_s).astype(jnp.bfloat16),
        "wf_t": pad_w(wf_t).astype(jnp.bfloat16),
        "bf": pad_b(params["bf"]),
        "hidden_size": h,
        "h_pad": h_pad,
    }


def api_knowledge_distillation(student_logits, teacher_logits, prepared,
                               temperature=2.0, alpha=0.5):
    """Mirror of APIKnowledgeDistillation.forward (teacher logits supplied)."""
    B, S, H = student_logits.shape
    M = B * S
    assert prepared["hidden_size"] == H
    h_pad = prepared["h_pad"]

    budget = _vmem_budget_bytes()
    # Resident weights are single-buffered (pl.Buffered(1)) -> one copy each.
    weight_bytes = 3 * h_pad * h_pad * 2 + 2 * h_pad * 4
    avail = budget - weight_bytes
    if weight_bytes > (3 * budget) // 4 or avail < 2 * 3 * 8 * h_pad * 2:
        # TODO(synk): add the K-streamed weight path (trailing "arbitrary"
        # reduction axis + f32 VMEM accumulator) for hidden sizes whose weights
        # do not fit VMEM-resident on this generation.
        raise NotImplementedError(
            f"hidden_size={H} (h_pad={h_pad}) exceeds the VMEM-resident weight "
            f"budget ({budget} bytes/core); streamed-weight path not implemented.")

    tile_m, num_blocks, m_pad = _choose_tile_m(M, h_pad, avail)

    # bf16 activation streams in HBM (halves the memory-bound traffic).
    s2d = student_logits.reshape(M, H).astype(jnp.bfloat16)
    t2d = teacher_logits.reshape(M, H).astype(jnp.bfloat16)
    if (m_pad, h_pad) != (M, H):
        s2d = jnp.pad(s2d, ((0, m_pad - M), (0, h_pad - H)))
        t2d = jnp.pad(t2d, ((0, m_pad - M), (0, h_pad - H)))

    kernel = functools.partial(
        _kd_kernel,
        inv_t=float(1.0 / temperature),
        m_actual=M,
        h_actual=H,
        tile_m=tile_m,
    )

    # VMEM budget: single-buffered bf16 weights + double-buffered bf16 tiles.
    pipe_bytes = 2 * (3 * tile_m * h_pad * 2 + 2 * 128 * 4)
    vmem_limit = int(min(budget,
                         max(weight_bytes + pipe_bytes + (8 << 20), 32 << 20)))

    cost = pl.CostEstimate(
        flops=6 * m_pad * h_pad * h_pad,
        transcendentals=2 * m_pad * h_pad + 2 * m_pad,     # exps + per-row logs
        bytes_accessed=(3 * m_pad * h_pad * 2             # bf16 s, t in + fused out
                        + 3 * h_pad * h_pad * 2           # bf16 resident weights
                        + 2 * h_pad * 4                   # f32 biases
                        + num_blocks * 2 * 128 * 4),      # loss partials
    )

    def _run(single_buffer_weights):
        resident = ({"pipeline_mode": pl.Buffered(1)}
                    if single_buffer_weights else {})
        in_specs = [
            pl.BlockSpec((tile_m, h_pad), lambda i: (i, 0)),             # student
            pl.BlockSpec((tile_m, h_pad), lambda i: (i, 0)),             # teacher
            pl.BlockSpec((h_pad, h_pad), lambda i: (0, 0), **resident),  # wp
            pl.BlockSpec((1, h_pad), lambda i: (0, 0), **resident),      # bp
            pl.BlockSpec((h_pad, h_pad), lambda i: (0, 0), **resident),  # wf_s
            pl.BlockSpec((h_pad, h_pad), lambda i: (0, 0), **resident),  # wf_t
            pl.BlockSpec((1, h_pad), lambda i: (0, 0), **resident),      # bf
        ]
        return pl.pallas_call(
            kernel,
            grid=(num_blocks,),
            in_specs=in_specs,
            out_specs=(
                pl.BlockSpec((tile_m, h_pad), lambda i: (i, 0)),   # fused features
                pl.BlockSpec((1, 2, 128), lambda i: (i, 0, 0)),    # loss partials
            ),
            out_shape=(
                jax.ShapeDtypeStruct((m_pad, h_pad), jnp.bfloat16),
                jax.ShapeDtypeStruct((num_blocks, 2, 128), jnp.float32),
            ),
            compiler_params=pltpu.CompilerParams(
                dimension_semantics=("parallel",),
                vmem_limit_bytes=vmem_limit,
            ),
            cost_estimate=cost,
        )(s2d, t2d, prepared["wp"], prepared["bp"],
          prepared["wf_s"], prepared["wf_t"], prepared["bf"])

    try:
        fused_pad, partials = _run(True)
    except Exception:
        # TODO(synk): drop this fallback once pl.Buffered(1) single-buffering of
        # constant-index weight blocks is confirmed on all deployed jax versions.
        fused_pad, partials = _run(False)

    # Finish the (tiny) loss reductions in plain JAX so the kernel grid can run
    # fully parallel across TensorCores.
    kl_total = jnp.sum(partials[:, 0, 0])
    sq_total = jnp.sum(partials[:, 1, 0])

    # KLDivLoss(reduction='batchmean') on the [B, S, H] input divides by B (the
    # leading dim) -- the PyTorch module never flattens before kl_div.
    distillation_loss = (kl_total / float(B)) * (temperature * temperature)
    student_loss = sq_total / float(M * H)
    total_loss = alpha * distillation_loss + (1.0 - alpha) * student_loss

    # fused_features kept bf16 (narrow HBM writeback); losses are f32.
    fused = fused_pad[:M, :H].reshape(B, S, H)
    return {
        "loss": total_loss,
        "distillation_loss": distillation_loss,
        "student_loss": student_loss,
        "fused_features": fused,
    }


def _init_params(key, hidden_size):
    """Deterministic synthetic init matching nn.Linear shapes (torch layout)."""
    k1, k2, k3, k4 = jax.random.split(key, 4)
    bound_p = 1.0 / jnp.sqrt(hidden_size)
    bound_f = 1.0 / jnp.sqrt(2 * hidden_size)
    return {
        "wp": jax.random.uniform(k1, (hidden_size, hidden_size),
                                 jnp.float32, -bound_p, bound_p),
        "bp": jax.random.uniform(k2, (hidden_size,),
                                 jnp.float32, -bound_p, bound_p),
        "wf": jax.random.uniform(k3, (hidden_size, 2 * hidden_size),
                                 jnp.float32, -bound_f, bound_f),
        "bf": jax.random.uniform(k4, (hidden_size,),
                                 jnp.float32, -bound_f, bound_f),
    }


if __name__ == "__main__":
    B, S, H = 2, 8, 32
    key = jax.random.PRNGKey(0)
    k_s, k_t, k_p = jax.random.split(key, 3)

    student_logits = jax.random.normal(k_s, (B, S, H), jnp.float32)
    # TODO(synk): teacher_logits would come from the DeepSeek API + tokenizer;
    # here it is a synthetic float tensor of the same shape as student_logits.
    teacher_logits = jax.random.normal(k_t, (B, S, H), jnp.float32)

    params = _init_params(k_p, H)
    prepared = prepare_params(params, H)   # one-time weight prep (not per call)

    out = api_knowledge_distillation(student_logits, teacher_logits, prepared,
                                     temperature=2.0, alpha=0.5)
    jax.block_until_ready(out)
    print("KERNEL_OK")
</pallas_src>

<mosaic_0001>
module attributes {stable_mosaic.version = 11 : i64} {
  func.func @_kd_kernel(%arg0: i32, %arg1: memref<8x128xbf16, #tpu.memory_space<vmem>>, %arg2: memref<8x128xbf16, #tpu.memory_space<vmem>>, %arg3: memref<128x128xbf16, #tpu.memory_space<vmem>>, %arg4: memref<1x128xf32, #tpu.memory_space<vmem>>, %arg5: memref<128x128xbf16, #tpu.memory_space<vmem>>, %arg6: memref<128x128xbf16, #tpu.memory_space<vmem>>, %arg7: memref<1x128xf32, #tpu.memory_space<vmem>>, %arg8: memref<8x128xbf16, #tpu.memory_space<vmem>>, %arg9: memref<1x2x128xf32, #tpu.memory_space<vmem>>) attributes {dimension_semantics = [#tpu.dimension_semantics<parallel>], iteration_bounds = array<i64: 2>, scalar_prefetch = 0 : i64, scratch_operands = 0 : i64, tpu.core_type = #tpu.core_type<tc>, window_params = [{transform_indices = @transform_0, window_bounds = array<i64: 8, 128>}, {transform_indices = @transform_1, window_bounds = array<i64: 8, 128>}, {pipeline_mode = #tpu.pipeline_mode<synchronous>, transform_indices = @transform_2, window_bounds = array<i64: 128, 128>}, {pipeline_mode = #tpu.pipeline_mode<synchronous>, transform_indices = @transform_3, window_bounds = array<i64: 1, 128>}, {pipeline_mode = #tpu.pipeline_mode<synchronous>, transform_indices = @transform_4, window_bounds = array<i64: 128, 128>}, {pipeline_mode = #tpu.pipeline_mode<synchronous>, transform_indices = @transform_5, window_bounds = array<i64: 128, 128>}, {pipeline_mode = #tpu.pipeline_mode<synchronous>, transform_indices = @transform_6, window_bounds = array<i64: 1, 128>}, {transform_indices = @transform_7, window_bounds = array<i64: 8, 128>}, {transform_indices = @transform_8, window_bounds = array<i64: 1, 2, 128>}]} {
    %c0 = arith.constant 0 : index
    %c0_0 = arith.constant 0 : index
    %0 = vector.load %arg1[%c0, %c0_0] : memref<8x128xbf16, #tpu.memory_space<vmem>>, vector<8x128xbf16>
    %c0_1 = arith.constant 0 : index
    %c0_2 = arith.constant 0 : index
    %1 = vector.load %arg2[%c0_1, %c0_2] : memref<8x128xbf16, #tpu.memory_space<vmem>>, vector<8x128xbf16>
    %2 = arith.extf %0 : vector<8x128xbf16> to vector<8x128xf32>
    %3 = arith.extf %1 : vector<8x128xbf16> to vector<8x128xf32>
    %4 = tpu.iota {dimensions = array<i32: 1>} : vector<1x128xi32>
    %c32_i32 = arith.constant 32 : i32
    %5 = vector.broadcast %c32_i32 : i32 to vector<1x128xi32>
    %6 = arith.cmpi slt, %4, %5 : vector<1x128xi32>
    %7 = tpu.iota {dimensions = array<i32: 0>} : vector<8x1xi32>
    %c8_i32 = arith.constant 8 : i32
    %8 = arith.muli %arg0, %c8_i32 : i32
    %9 = vector.broadcast %8 : i32 to vector<8x1xi32>
    %10 = arith.addi %7, %9 : vector<8x1xi32>
    %c16_i32 = arith.constant 16 : i32
    %11 = vector.broadcast %c16_i32 : i32 to vector<8x1xi32>
    %12 = arith.cmpi slt, %10, %11 : vector<8x1xi32>
    %13 = arith.extui %12 : vector<8x1xi1> to vector<8x1xi32>
    %14 = arith.sitofp %13 : vector<8x1xi32> to vector<8x1xf32>
    %c0_3 = arith.constant 0 : index
    %c0_4 = arith.constant 0 : index
    %15 = vector.load %arg3[%c0_3, %c0_4] : memref<128x128xbf16, #tpu.memory_space<vmem>>, vector<128x128xbf16>
    %cst = arith.constant dense<0.000000e+00> : vector<8x128xf32>
    %16 = tpu.matmul %0, %15, %cst {dimension_numbers = #tpu.dot_dimension_numbers<[1], [0], [0], [1], [0, 0, 1, 1], [], []>} : vector<8x128xbf16>, vector<128x128xbf16>, vector<8x128xf32> -> vector<8x128xf32>
    %c0_5 = arith.constant 0 : index
    %c0_6 = arith.constant 0 : index
    %17 = vector.load %arg4[%c0_5, %c0_6] : memref<1x128xf32, #tpu.memory_space<vmem>>, vector<1x128xf32>
    %18 = vector.broadcast %17 : vector<1x128xf32> to vector<8x128xf32>
    %19 = arith.addf %16, %18 : vector<8x128xf32>
    %cst_7 = arith.constant 5.000000e-01 : f32
    %20 = vector.broadcast %cst_7 : f32 to vector<8x128xf32>
    %21 = arith.mulf %19, %20 : vector<8x128xf32>
    %cst_8 = arith.constant -1.000000e+30 : f32
    %22 = vector.shape_cast %6 : vector<1x128xi1> to vector<1x128xi1>
    %23 = vector.broadcast %22 : vector<1x128xi1> to vector<8x128xi1>
    %24 = vector.broadcast %cst_8 : f32 to vector<8x128xf32>
    %25 = arith.select %23, %21, %24 : vector<8x128xi1>, vector<8x128xf32>
    %cst_9 = arith.constant dense<0xFF800000> : vector<8xf32>
    %26 = vector.multi_reduction <maximumf>, %25, %cst_9 [1] : vector<8x128xf32> to vector<8xf32>
    %27 = vector.shape_cast %26 : vector<8xf32> to vector<8x1xf32>
    %28 = vector.broadcast %27 : vector<8x1xf32> to vector<8x128xf32>
    %29 = arith.subf %25, %28 : vector<8x128xf32>
    %30 = math.exp %29 : vector<8x128xf32>
    %cst_10 = arith.constant dense<0.000000e+00> : vector<8xf32>
    %31 = vector.multi_reduction <add>, %30, %cst_10 [1] : vector<8x128xf32> to vector<8xf32>
    %32 = vector.shape_cast %31 : vector<8xf32> to vector<8x1xf32>
    %33 = math.log %32 : vector<8x1xf32>
    %34 = vector.broadcast %33 : vector<8x1xf32> to vector<8x128xf32>
    %35 = arith.subf %29, %34 : vector<8x128xf32>
    %cst_11 = arith.constant 5.000000e-01 : f32
    %36 = vector.broadcast %cst_11 : f32 to vector<8x128xf32>
    %37 = arith.mulf %3, %36 : vector<8x128xf32>
    %cst_12 = arith.constant -1.000000e+30 : f32
    %38 = vector.shape_cast %6 : vector<1x128xi1> to vector<1x128xi1>
    %39 = vector.broadcast %38 : vector<1x128xi1> to vector<8x128xi1>
    %40 = vector.broadcast %cst_12 : f32 to vector<8x128xf32>
    %41 = arith.select %39, %37, %40 : vector<8x128xi1>, vector<8x128xf32>
    %cst_13 = arith.constant dense<0xFF800000> : vector<8xf32>
    %42 = vector.multi_reduction <maximumf>, %41, %cst_13 [1] : vector<8x128xf32> to vector<8xf32>
    %43 = vector.shape_cast %42 : vector<8xf32> to vector<8x1xf32>
    %44 = vector.broadcast %43 : vector<8x1xf32> to vector<8x128xf32>
    %45 = arith.subf %41, %44 : vector<8x128xf32>
    %46 = math.exp %45 : vector<8x128xf32>
    %cst_14 = arith.constant dense<0.000000e+00> : vector<8xf32>
    %47 = vector.multi_reduction <add>, %46, %cst_14 [1] : vector<8x128xf32> to vector<8xf32>
    %48 = vector.shape_cast %47 : vector<8xf32> to vector<8x1xf32>
    %49 = math.log %48 : vector<8x1xf32>
    %50 = vector.broadcast %49 : vector<8x1xf32> to vector<8x128xf32>
    %51 = arith.subf %45, %50 : vector<8x128xf32>
    %52 = vector.broadcast %48 : vector<8x1xf32> to vector<8x128xf32>
    %53 = arith.divf %46, %52 : vector<8x128xf32>
    %54 = arith.subf %51, %35 : vector<8x128xf32>
    %55 = arith.mulf %53, %54 : vector<8x128xf32>
    %cst_15 = arith.constant dense<0.000000e+00> : vector<8xf32>
    %56 = vector.multi_reduction <add>, %55, %cst_15 [1] : vector<8x128xf32> to vector<8xf32>
    %57 = vector.shape_cast %56 : vector<8xf32> to vector<8x1xf32>
    %58 = arith.mulf %57, %14 : vector<8x1xf32>
    %59 = vector.shape_cast %58 : vector<8x1xf32> to vector<1x8x1xf32>
    %cst_16 = arith.constant dense<0.000000e+00> : vector<1xf32>
    %60 = vector.multi_reduction <add>, %59, %cst_16 [1, 2] : vector<1x8x1xf32> to vector<1xf32>
    %61 = vector.shape_cast %60 : vector<1xf32> to vector<1x1x1xf32>
    %62 = vector.extract %61[0, 0, 0] : f32 from vector<1x1x1xf32>
    %63 = arith.subf %2, %3 : vector<8x128xf32>
    %64 = arith.mulf %63, %63 : vector<8x128xf32>
    %65 = vector.shape_cast %64 : vector<8x128xf32> to vector<1x8x128xf32>
    %cst_17 = arith.constant dense<0.000000e+00> : vector<1xf32>
    %66 = vector.multi_reduction <add>, %65, %cst_17 [1, 2] : vector<1x8x128xf32> to vector<1xf32>
    %67 = vector.shape_cast %66 : vector<1xf32> to vector<1x1x1xf32>
    %68 = vector.extract %67[0, 0, 0] : f32 from vector<1x1x1xf32>
    %69 = arith.truncf %19 : vector<8x128xf32> to vector<8x128xbf16>
    %c0_18 = arith.constant 0 : index
    %c0_19 = arith.constant 0 : index
    %70 = vector.load %arg5[%c0_18, %c0_19] : memref<128x128xbf16, #tpu.memory_space<vmem>>, vector<128x128xbf16>
    %cst_20 = arith.constant dense<0.000000e+00> : vector<8x128xf32>
    %71 = tpu.matmul %69, %70, %cst_20 {dimension_numbers = #tpu.dot_dimension_numbers<[1], [0], [0], [1], [0, 0, 1, 1], [], []>} : vector<8x128xbf16>, vector<128x128xbf16>, vector<8x128xf32> -> vector<8x128xf32>
    %c0_21 = arith.constant 0 : index
    %c0_22 = arith.constant 0 : index
    %72 = vector.load %arg6[%c0_21, %c0_22] : memref<128x128xbf16, #tpu.memory_space<vmem>>, vector<128x128xbf16>
    %cst_23 = arith.constant dense<0.000000e+00> : vector<8x128xf32>
    %73 = tpu.matmul %1, %72, %cst_23 {dimension_numbers = #tpu.dot_dimension_numbers<[1], [0], [0], [1], [0, 0, 1, 1], [], []>} : vector<8x128xbf16>, vector<128x128xbf16>, vector<8x128xf32> -> vector<8x128xf32>
    %74 = arith.addf %71, %73 : vector<8x128xf32>
    %c0_24 = arith.constant 0 : index
    %c0_25 = arith.constant 0 : index
    %75 = vector.load %arg7[%c0_24, %c0_25] : memref<1x128xf32, #tpu.memory_space<vmem>>, vector<1x128xf32>
    %76 = vector.broadcast %75 : vector<1x128xf32> to vector<8x128xf32>
    %77 = arith.addf %74, %76 : vector<8x128xf32>
    %78 = arith.truncf %77 : vector<8x128xf32> to vector<8x128xbf16>
    %c0_26 = arith.constant 0 : index
    %c0_27 = arith.constant 0 : index
    %79 = vector.load %arg8[%c0_26, %c0_27] : memref<8x128xbf16, #tpu.memory_space<vmem>>, vector<8x128xbf16>
    tpu.vector_store %arg8[%c0_26, %c0_27], %78 {strides = array<i32>} : memref<8x128xbf16, #tpu.memory_space<vmem>>, vector<8x128xbf16>,
    %80 = tpu.iota {dimensions = array<i32: 1>} : vector<1x2x128xi32>
    %c0_i32 = arith.constant 0 : i32
    %81 = vector.broadcast %c0_i32 : i32 to vector<1x2x128xi32>
    %82 = arith.cmpi eq, %80, %81 : vector<1x2x128xi32>
    %83 = vector.broadcast %62 : f32 to vector<1x2x128xf32>
    %84 = vector.broadcast %68 : f32 to vector<1x2x128xf32>
    %85 = arith.select %82, %83, %84 : vector<1x2x128xi1>, vector<1x2x128xf32>
    %c0_28 = arith.constant 0 : index
    %c0_29 = arith.constant 0 : index
    %c0_30 = arith.constant 0 : index
    %86 = vector.load %arg9[%c0_28, %c0_29, %c0_30] : memref<1x2x128xf32, #tpu.memory_space<vmem>>, vector<1x2x128xf32>
    tpu.vector_store %arg9[%c0_28, %c0_29, %c0_30], %85 {strides = array<i32>} : memref<1x2x128xf32, #tpu.memory_space<vmem>>, vector<1x2x128xf32>,
    return
  }
  func.func @transform_0(%arg0: i32) -> (i32, i32) {
    %c0_i32 = arith.constant 0 : i32
    %c0_i32_0 = arith.constant 0 : i32
    return %arg0, %c0_i32 : i32, i32
  }
  func.func @transform_1(%arg0: i32) -> (i32, i32) {
    %c0_i32 = arith.constant 0 : i32
    %c0_i32_0 = arith.constant 0 : i32
    return %arg0, %c0_i32 : i32, i32
  }
  func.func @transform_2(%arg0: i32) -> (i32, i32) {
    %c0_i32 = arith.constant 0 : i32
    %c0_i32_0 = arith.constant 0 : i32
    %c0_i32_1 = arith.constant 0 : i32
    return %c0_i32, %c0_i32_0 : i32, i32
  }
  func.func @transform_3(%arg0: i32) -> (i32, i32) {
    %c0_i32 = arith.constant 0 : i32
    %c0_i32_0 = arith.constant 0 : i32
    %c0_i32_1 = arith.constant 0 : i32
    return %c0_i32, %c0_i32_0 : i32, i32
  }
  func.func @transform_4(%arg0: i32) -> (i32, i32) {
    %c0_i32 = arith.constant 0 : i32
    %c0_i32_0 = arith.constant 0 : i32
    %c0_i32_1 = arith.constant 0 : i32
    return %c0_i32, %c0_i32_0 : i32, i32
  }
  func.func @transform_5(%arg0: i32) -> (i32, i32) {
    %c0_i32 = arith.constant 0 : i32
    %c0_i32_0 = arith.constant 0 : i32
    %c0_i32_1 = arith.constant 0 : i32
    return %c0_i32, %c0_i32_0 : i32, i32
  }
  func.func @transform_6(%arg0: i32) -> (i32, i32) {
    %c0_i32 = arith.constant 0 : i32
    %c0_i32_0 = arith.constant 0 : i32
    %c0_i32_1 = arith.constant 0 : i32
    return %c0_i32, %c0_i32_0 : i32, i32
  }
  func.func @transform_7(%arg0: i32) -> (i32, i32) {
    %c0_i32 = arith.constant 0 : i32
    %c0_i32_0 = arith.constant 0 : i32
    return %arg0, %c0_i32 : i32, i32
  }
  func.func @transform_8(%arg0: i32) -> (i32, i32, i32) {
    %c0_i32 = arith.constant 0 : i32
    %c0_i32_0 = arith.constant 0 : i32
    %c0_i32_1 = arith.constant 0 : i32
    return %arg0, %c0_i32, %c0_i32_0 : i32, i32, i32
  }
}

module attributes {stable_mosaic.version = 11 : i64} {
  func.func @_kd_kernel(%arg0: i32, %arg1: memref<8x128xbf16, #tpu.memory_space<vmem>>, %arg2: memref<8x128xbf16, #tpu.memory_space<vmem>>, %arg3: memref<128x128xbf16, #tpu.memory_space<vmem>>, %arg4: memref<1x128xf32, #tpu.memory_space<vmem>>, %arg5: memref<128x128xbf16, #tpu.memory_space<vmem>>, %arg6: memref<128x128xbf16, #tpu.memory_space<vmem>>, %arg7: memref<1x128xf32, #tpu.memory_space<vmem>>, %arg8: memref<8x128xbf16, #tpu.memory_space<vmem>>, %arg9: memref<1x2x128xf32, #tpu.memory_space<vmem>>) attributes {dimension_semantics = [#tpu.dimension_semantics<parallel>], iteration_bounds = array<i64: 2>, scalar_prefetch = 0 : i64, scratch_operands = 0 : i64, tpu.core_type = #tpu.core_type<tc>, window_params = [{transform_indices = @transform_0, window_bounds = array<i64: 8, 128>}, {transform_indices = @transform_1, window_bounds = array<i64: 8, 128>}, {pipeline_mode = #tpu.pipeline_mode<synchronous>, transform_indices = @transform_2, window_bounds = array<i64: 128, 128>}, {pipeline_mode = #tpu.pipeline_mode<synchronous>, transform_indices = @transform_3, window_bounds = array<i64: 1, 128>}, {pipeline_mode = #tpu.pipeline_mode<synchronous>, transform_indices = @transform_4, window_bounds = array<i64: 128, 128>}, {pipeline_mode = #tpu.pipeline_mode<synchronous>, transform_indices = @transform_5, window_bounds = array<i64: 128, 128>}, {pipeline_mode = #tpu.pipeline_mode<synchronous>, transform_indices = @transform_6, window_bounds = array<i64: 1, 128>}, {transform_indices = @transform_7, window_bounds = array<i64: 8, 128>}, {transform_indices = @transform_8, window_bounds = array<i64: 1, 2, 128>}]} {
    %c0 = arith.constant 0 : index
    %c0_0 = arith.constant 0 : index
    %0 = vector.load %arg1[%c0, %c0_0] : memref<8x128xbf16, #tpu.memory_space<vmem>>, vector<8x128xbf16>
    %c0_1 = arith.constant 0 : index
    %c0_2 = arith.constant 0 : index
    %1 = vector.load %arg2[%c0_1, %c0_2] : memref<8x128xbf16, #tpu.memory_space<vmem>>, vector<8x128xbf16>
    %2 = arith.extf %0 : vector<8x128xbf16> to vector<8x128xf32>
    %3 = arith.extf %1 : vector<8x128xbf16> to vector<8x128xf32>
    %4 = tpu.iota {dimensions = array<i32: 1>} : vector<1x128xi32>
    %c32_i32 = arith.constant 32 : i32
    %5 = vector.broadcast %c32_i32 : i32 to vector<1x128xi32>
    %6 = arith.cmpi slt, %4, %5 : vector<1x128xi32>
    %7 = tpu.iota {dimensions = array<i32: 0>} : vector<8x1xi32>
    %c8_i32 = arith.constant 8 : i32
    %8 = arith.muli %arg0, %c8_i32 : i32
    %9 = vector.broadcast %8 : i32 to vector<8x1xi32>
    %10 = arith.addi %7, %9 : vector<8x1xi32>
    %c16_i32 = arith.constant 16 : i32
    %11 = vector.broadcast %c16_i32 : i32 to vector<8x1xi32>
    %12 = arith.cmpi slt, %10, %11 : vector<8x1xi32>
    %13 = arith.extui %12 : vector<8x1xi1> to vector<8x1xi32>
    %14 = arith.sitofp %13 : vector<8x1xi32> to vector<8x1xf32>
    %c0_3 = arith.constant 0 : index
    %c0_4 = arith.constant 0 : index
    %15 = vector.load %arg3[%c0_3, %c0_4] : memref<128x128xbf16, #tpu.memory_space<vmem>>, vector<128x128xbf16>
    %cst = arith.constant dense<0.000000e+00> : vector<8x128xf32>
    %16 = tpu.matmul %0, %15, %cst {dimension_numbers = #tpu.dot_dimension_numbers<[1], [0], [0], [1], [0, 0, 1, 1], [], []>} : vector<8x128xbf16>, vector<128x128xbf16>, vector<8x128xf32> -> vector<8x128xf32>
    %c0_5 = arith.constant 0 : index
    %c0_6 = arith.constant 0 : index
    %17 = vector.load %arg4[%c0_5, %c0_6] : memref<1x128xf32, #tpu.memory_space<vmem>>, vector<1x128xf32>
    %18 = vector.broadcast %17 : vector<1x128xf32> to vector<8x128xf32>
    %19 = arith.addf %16, %18 : vector<8x128xf32>
    %cst_7 = arith.constant 5.000000e-01 : f32
    %20 = vector.broadcast %cst_7 : f32 to vector<8x128xf32>
    %21 = arith.mulf %19, %20 : vector<8x128xf32>
    %cst_8 = arith.constant -1.000000e+30 : f32
    %22 = vector.shape_cast %6 : vector<1x128xi1> to vector<1x128xi1>
    %23 = vector.broadcast %22 : vector<1x128xi1> to vector<8x128xi1>
    %24 = vector.broadcast %cst_8 : f32 to vector<8x128xf32>
    %25 = arith.select %23, %21, %24 : vector<8x128xi1>, vector<8x128xf32>
    %cst_9 = arith.constant dense<0xFF800000> : vector<8xf32>
    %26 = vector.multi_reduction <maximumf>, %25, %cst_9 [1] : vector<8x128xf32> to vector<8xf32>
    %27 = vector.shape_cast %26 : vector<8xf32> to vector<8x1xf32>
    %28 = vector.broadcast %27 : vector<8x1xf32> to vector<8x128xf32>
    %29 = arith.subf %25, %28 : vector<8x128xf32>
    %30 = math.exp %29 : vector<8x128xf32>
    %cst_10 = arith.constant dense<0.000000e+00> : vector<8xf32>
    %31 = vector.multi_reduction <add>, %30, %cst_10 [1] : vector<8x128xf32> to vector<8xf32>
    %32 = vector.shape_cast %31 : vector<8xf32> to vector<8x1xf32>
    %33 = math.log %32 : vector<8x1xf32>
    %34 = vector.broadcast %33 : vector<8x1xf32> to vector<8x128xf32>
    %35 = arith.subf %29, %34 : vector<8x128xf32>
    %cst_11 = arith.constant 5.000000e-01 : f32
    %36 = vector.broadcast %cst_11 : f32 to vector<8x128xf32>
    %37 = arith.mulf %3, %36 : vector<8x128xf32>
    %cst_12 = arith.constant -1.000000e+30 : f32
    %38 = vector.shape_cast %6 : vector<1x128xi1> to vector<1x128xi1>
    %39 = vector.broadcast %38 : vector<1x128xi1> to vector<8x128xi1>
    %40 = vector.broadcast %cst_12 : f32 to vector<8x128xf32>
    %41 = arith.select %39, %37, %40 : vector<8x128xi1>, vector<8x128xf32>
    %cst_13 = arith.constant dense<0xFF800000> : vector<8xf32>
    %42 = vector.multi_reduction <maximumf>, %41, %cst_13 [1] : vector<8x128xf32> to vector<8xf32>
    %43 = vector.shape_cast %42 : vector<8xf32> to vector<8x1xf32>
    %44 = vector.broadcast %43 : vector<8x1xf32> to vector<8x128xf32>
    %45 = arith.subf %41, %44 : vector<8x128xf32>
    %46 = math.exp %45 : vector<8x128xf32>
    %cst_14 = arith.constant dense<0.000000e+00> : vector<8xf32>
    %47 = vector.multi_reduction <add>, %46, %cst_14 [1] : vector<8x128xf32> to vector<8xf32>
    %48 = vector.shape_cast %47 : vector<8xf32> to vector<8x1xf32>
    %49 = math.log %48 : vector<8x1xf32>
    %50 = vector.broadcast %49 : vector<8x1xf32> to vector<8x128xf32>
    %51 = arith.subf %45, %50 : vector<8x128xf32>
    %52 = vector.broadcast %48 : vector<8x1xf32> to vector<8x128xf32>
    %53 = arith.divf %46, %52 : vector<8x128xf32>
    %54 = arith.subf %51, %35 : vector<8x128xf32>
    %55 = arith.mulf %53, %54 : vector<8x128xf32>
    %cst_15 = arith.constant dense<0.000000e+00> : vector<8xf32>
    %56 = vector.multi_reduction <add>, %55, %cst_15 [1] : vector<8x128xf32> to vector<8xf32>
    %57 = vector.shape_cast %56 : vector<8xf32> to vector<8x1xf32>
    %58 = arith.mulf %57, %14 : vector<8x1xf32>
    %59 = vector.shape_cast %58 : vector<8x1xf32> to vector<1x8x1xf32>
    %cst_16 = arith.constant dense<0.000000e+00> : vector<1xf32>
    %60 = vector.multi_reduction <add>, %59, %cst_16 [1, 2] : vector<1x8x1xf32> to vector<1xf32>
    %61 = vector.shape_cast %60 : vector<1xf32> to vector<1x1x1xf32>
    %62 = vector.extract %61[0, 0, 0] : f32 from vector<1x1x1xf32>
    %63 = arith.subf %2, %3 : vector<8x128xf32>
    %64 = arith.mulf %63, %63 : vector<8x128xf32>
    %65 = vector.shape_cast %64 : vector<8x128xf32> to vector<1x8x128xf32>
    %cst_17 = arith.constant dense<0.000000e+00> : vector<1xf32>
    %66 = vector.multi_reduction <add>, %65, %cst_17 [1, 2] : vector<1x8x128xf32> to vector<1xf32>
    %67 = vector.shape_cast %66 : vector<1xf32> to vector<1x1x1xf32>
    %68 = vector.extract %67[0, 0, 0] : f32 from vector<1x1x1xf32>
    %69 = arith.truncf %19 : vector<8x128xf32> to vector<8x128xbf16>
    %c0_18 = arith.constant 0 : index
    %c0_19 = arith.constant 0 : index
    %70 = vector.load %arg5[%c0_18, %c0_19] : memref<128x128xbf16, #tpu.memory_space<vmem>>, vector<128x128xbf16>
    %cst_20 = arith.constant dense<0.000000e+00> : vector<8x128xf32>
    %71 = tpu.matmul %69, %70, %cst_20 {dimension_numbers = #tpu.dot_dimension_numbers<[1], [0], [0], [1], [0, 0, 1, 1], [], []>} : vector<8x128xbf16>, vector<128x128xbf16>, vector<8x128xf32> -> vector<8x128xf32>
    %c0_21 = arith.constant 0 : index
    %c0_22 = arith.constant 0 : index
    %72 = vector.load %arg6[%c0_21, %c0_22] : memref<128x128xbf16, #tpu.memory_space<vmem>>, vector<128x128xbf16>
    %cst_23 = arith.constant dense<0.000000e+00> : vector<8x128xf32>
    %73 = tpu.matmul %1, %72, %cst_23 {dimension_numbers = #tpu.dot_dimension_numbers<[1], [0], [0], [1], [0, 0, 1, 1], [], []>} : vector<8x128xbf16>, vector<128x128xbf16>, vector<8x128xf32> -> vector<8x128xf32>
    %74 = arith.addf %71, %73 : vector<8x128xf32>
    %c0_24 = arith.constant 0 : index
    %c0_25 = arith.constant 0 : index
    %75 = vector.load %arg7[%c0_24, %c0_25] : memref<1x128xf32, #tpu.memory_space<vmem>>, vector<1x128xf32>
    %76 = vector.broadcast %75 : vector<1x128xf32> to vector<8x128xf32>
    %77 = arith.addf %74, %76 : vector<8x128xf32>
    %78 = arith.truncf %77 : vector<8x128xf32> to vector<8x128xbf16>
    %c0_26 = arith.constant 0 : index
    %c0_27 = arith.constant 0 : index
    %79 = vector.load %arg8[%c0_26, %c0_27] : memref<8x128xbf16, #tpu.memory_space<vmem>>, vector<8x128xbf16>
    tpu.vector_store %arg8[%c0_26, %c0_27], %78 {strides = array<i32>} : memref<8x128xbf16, #tpu.memory_space<vmem>>, vector<8x128xbf16>,
    %80 = tpu.iota {dimensions = array<i32: 1>} : vector<1x2x128xi32>
    %c0_i32 = arith.constant 0 : i32
    %81 = vector.broadcast %c0_i32 : i32 to vector<1x2x128xi32>
    %82 = arith.cmpi eq, %80, %81 : vector<1x2x128xi32>
    %83 = vector.broadcast %62 : f32 to vector<1x2x128xf32>
    %84 = vector.broadcast %68 : f32 to vector<1x2x128xf32>
    %85 = arith.select %82, %83, %84 : vector<1x2x128xi1>, vector<1x2x128xf32>
    %c0_28 = arith.constant 0 : index
    %c0_29 = arith.constant 0 : index
    %c0_30 = arith.constant 0 : index
    %86 = vector.load %arg9[%c0_28, %c0_29, %c0_30] : memref<1x2x128xf32, #tpu.memory_space<vmem>>, vector<1x2x128xf32>
    tpu.vector_store %arg9[%c0_28, %c0_29, %c0_30], %85 {strides = array<i32>} : memref<1x2x128xf32, #tpu.memory_space<vmem>>, vector<1x2x128xf32>,
    return
  }
  func.func @transform_0(%arg0: i32) -> (i32, i32) {
    %c0_i32 = arith.constant 0 : i32
    %c0_i32_0 = arith.constant 0 : i32
    return %arg0, %c0_i32 : i32, i32
  }
  func.func @transform_1(%arg0: i32) -> (i32, i32) {
    %c0_i32 = arith.constant 0 : i32
    %c0_i32_0 = arith.constant 0 : i32
    return %arg0, %c0_i32 : i32, i32
  }
  func.func @transform_2(%arg0: i32) -> (i32, i32) {
    %c0_i32 = arith.constant 0 : i32
    %c0_i32_0 = arith.constant 0 : i32
    %c0_i32_1 = arith.constant 0 : i32
    return %c0_i32, %c0_i32_0 : i32, i32
  }
  func.func @transform_3(%arg0: i32) -> (i32, i32) {
    %c0_i32 = arith.constant 0 : i32
    %c0_i32_0 = arith.constant 0 : i32
    %c0_i32_1 = arith.constant 0 : i32
    return %c0_i32, %c0_i32_0 : i32, i32
  }
  func.func @transform_4(%arg0: i32) -> (i32, i32) {
    %c0_i32 = arith.constant 0 : i32
    %c0_i32_0 = arith.constant 0 : i32
    %c0_i32_1 = arith.constant 0 : i32
    return %c0_i32, %c0_i32_0 : i32, i32
  }
  func.func @transform_5(%arg0: i32) -> (i32, i32) {
    %c0_i32 = arith.constant 0 : i32
    %c0_i32_0 = arith.constant 0 : i32
    %c0_i32_1 = arith.constant 0 : i32
    return %c0_i32, %c0_i32_0 : i32, i32
  }
  func.func @transform_6(%arg0: i32) -> (i32, i32) {
    %c0_i32 = arith.constant 0 : i32
    %c0_i32_0 = arith.constant 0 : i32
    %c0_i32_1 = arith.constant 0 : i32
    return %c0_i32, %c0_i32_0 : i32, i32
  }
  func.func @transform_7(%arg0: i32) -> (i32, i32) {
    %c0_i32 = arith.constant 0 : i32
    %c0_i32_0 = arith.constant 0 : i32
    return %arg0, %c0_i32 : i32, i32
  }
  func.func @transform_8(%arg0: i32) -> (i32, i32, i32) {
    %c0_i32 = arith.constant 0 : i32
    %c0_i32_0 = arith.constant 0 : i32
    %c0_i32_1 = arith.constant 0 : i32
    return %arg0, %c0_i32, %c0_i32_0 : i32, i32, i32
  }
}

</mosaic_0001>

<bundles_post_ra>
// kernel: tpu_custom_call.1
= control target key start
LH: loop header
LB: loop body
LE: loop exit
PB: predicated region body
PF: predicated region fallthrough
CT: control target
= control target key end

     0   :  { %s1751_s0 = inlined_call_operand.hbm [shape: bf16[16,128], index: 0, kind: input, shape index: {}]   ;;  %s1752_s1 = inlined_call_operand.hbm [shape: bf16[16,128], index: 1, kind: input, shape index: {}]   ;;  %s1753_s2 = inlined_call_operand.hbm [shape: bf16[128,128], index: 2, kind: input, shape index: {}]   ;;  %s1754_s3 = inlined_call_operand.vmem [shape: f32[1,128], index: 3, kind: input, shape index: {}]   ;;  %s1755_s4 = inlined_call_operand.hbm [shape: bf16[128,128], index: 4, kind: input, shape index: {}]   ;;  %s1756_s5 = inlined_call_operand.hbm [shape: bf16[128,128], index: 5, kind: input, shape index: {}]   ;;  %s1757_s6 = inlined_call_operand.vmem [shape: f32[1,128], index: 6, kind: input, shape index: {}]   ;;  %s1758_s7 = inlined_call_operand.hbm [shape: bf16[16,128], index: 7, kind: output, shape index: {0}]   ;;  %s1759_s8 = inlined_call_operand.hbm [shape: f32[2,2,128], index: 8, kind: output, shape index: {1}]  }
   0x1   :  { %1764 = sst [smem:[#allocation24_spill]] %s1753_s2 }
   0x2   :  { %1765 = sst [smem:[#allocation25_spill]] %s1755_s4 }
   0x3   :  { %1766 = sst [smem:[#allocation26_spill]] %s1756_s5 }
   0x4   :  { %14 = vsyncpa [#allocation3], 0 }
   0x5   :  { %16 = vsyncpa [#allocation3 + $0x1], 0 }
   0x6   :  { %17 = vsyncpa [#allocation6], 0 }
   0x7   :  { %19 = vsyncpa [#allocation6 + $0x1], 0 }
   0x8   :  { %20 = vsyncpa [#allocation9], 0 }
   0x9   :  { %21 = vsyncpa [#allocation4], 0 }
   0xa   :  { %23 = vsyncpa [#allocation4 + $0x1], 0 }
   0xb   :  { %24 = vsyncpa [#allocation13], 0 }
   0xc   :  { %26 = vsyncpa [#allocation13 + $0x1], 0  ;;  %s1507_s27 = smov 0   ;;  %s1509_s28 = smov 0  }
   0xd   :  { %s1511_s29 = smov 0   ;;  %s1513_s30 = smov 0  }
   0xe LB: > { %1767 = sst [smem:[#allocation20_spill]] %s1450_s29  ;;  %s1531_s12 = sadd.s32 4294967295, %s1454_s30   ;;  %s1454_s30 = sphi %s1513_s30, %s1783_s30   ;;  %s1450_s29 = sphi %s1511_s29, %s1785_s29   ;;  %s1446_s28 = sphi %s1509_s28, %s1787_s28   ;;  %s1442_s27 = sphi %s1507_s27, %s1786_s27  }
   0xf   : > { %1768 = sst [smem:[#allocation21_spill]] %s1454_s30  ;;  %p943_p0 = scmp.ge.s32.totalorder %s1454_s30, 1 }
  0x10   : > { %s1769_s2 = sld [smem:[#allocation24_spill]]  ;;  %p53_p1 = scmp.eq.s32.totalorder %s1531_s12, 0 }
  0x11   : > { %p246_p2 = scmp.lt.s32.totalorder %s1454_s30, 3  ;;  %s1456_s14 = smov [#allocation7]  }
  0x12   : > { %s259_s15 = sshll.u32 %s1456_s14, 4  ;;  %s1771_s4 = sld [smem:[#allocation25_spill]]  ;;  %s260_s15 = int_to_ptr.vmem [resolvable:$true] %s259_s15 }
  0x13   : > { %p1536_p3 = pnand %p943_p0, %p246_p2  ;;  %s1773_s5 = sld [smem:[#allocation26_spill]] }
  0x14   : > { %s1457_s23 = smov [#allocation8]   ;;  %s1458_s25 = smov 64  }
  0x15   : > { %p1112_p4 = pneg %p1536_p3  ;;  %s276_s24 = sshll.u32 %s1457_s23, 4  ;;  %s277_s24 = int_to_ptr.vmem [resolvable:$true] %s276_s24 }
  0x16   : > { %s257_s11 = sshll.u32 %s1769_s2, 4  ;;  %s1459_s26 = smov 4   ;;  %s258_s11 = int_to_ptr.hbm [resolvable:$true] %s257_s11 }
  0x17   : > { %p1548_p6 = pnand %p1112_p4, %p53_p1  ;;  %s1460_s9 = smov [#allocation10]  }
  0x18   : > { %s274_s18 = sshll.u32 %s1771_s4, 4  ;;  %s290_s10 = sshll.u32 %s1460_s9, 4  ;;  %s275_s18 = int_to_ptr.hbm [resolvable:$true] %s274_s18  ;;  %s291_s10 = int_to_ptr.vmem [resolvable:$true] %s290_s10 }
  0x19   : > { %s288_s22 = sshll.u32 %s1773_s5, 4  ;;  %s942_s14 = sadd.s32 4294967294, %s1454_s30   ;;  %s289_s22 = int_to_ptr.hbm [resolvable:$true] %s288_s22 }
  0x1a   : > { %1115 = dma.hbm_to_vmem [thread:$0]  (!%p1548_p6), %s258_s11, 1024, %s260_s15, [#allocation6], %s1458_s25, %s1458_s25, %s1459_s26  }
  0x1b   : > { %1118 = dma.hbm_to_vmem [thread:$0]  (!%p1548_p6), %s275_s18, 1024, %s277_s24, [#allocation9], %s1458_s25, %s1458_s25, %s1459_s26  }
  0x1c   : > { %1121 = dma.hbm_to_vmem [thread:$0]  (!%p1548_p6), %s289_s22, 1024, %s291_s10, [#allocation9], %s1458_s25, %s1458_s25, %s1459_s26  }
  0x1d   : > { %s1563_s16 = sadd.s32 1, %s1454_s30   ;;  %s39_s17 = sadd.s32 1, %s1450_s29 }
  0x1e   : > { %1774 = sst [smem:[#allocation22_spill]] %s1563_s16  ;;  %s36_s11 = ssub.s32 %s1454_s30, %s1563_s16 }
  0x1f   : > { %p46_p7 = scmp.ne.s32.totalorder %s1450_s29, %s1446_s28  ;;  %p37_p8 = scmp.eq.s32.totalorder %s36_s11, 0 }
  0x20   : > { %p47_p9 = scmp.eq.s32.totalorder %s1454_s30, 0  ;;  %p52_p10 = scmp.ne.s32.totalorder %s1446_s28, %s1442_s27 }
  0x21   : > { %p207_p11 = scmp.eq.s32.totalorder %s1531_s12, 1  ;;  %p213_p2 = scmp.eq.s32.totalorder %s942_s14, 1 }
  0x22   : > { %s1575_s15 = scalar_select %p37_p8, %s1450_s29, %s39_s17  }
  0x23   : > { %p1577_p12 = por %p47_p9, %p46_p7  ;;  %p1583_p13 = por %p53_p1, %p52_p10 }
  0x24   : > { %1775 = sst [smem:[#allocation23_spill]] %s1575_s15  ;;  %p1587_p0 = por %p207_p11, %p46_p7 }
  0x25   : > { %p1139_p4 = scmp.lt.s32.totalorder %s1454_s30, 2  ;;  %s307_s21 = sand.u32 1, %s1450_s29  }
  0x26   : > { %p1593_p6 = por %p213_p2, %p52_p10  ;;  %s948_s23 = sshll.u32 %s307_s21, 2 }
  0x27   : > { %s949_s24 = sshll.u32 %s1454_s30, 2  ;;  %s311_s17 = scalar_lea.vmem [#allocation2], %s948_s23 }
  0x28   : > { %s315_s9 = scalar_lea.hbm %s1751_s0, %s949_s24  ;;  %s319_s11 = sshll.u32 %s311_s17, 4  ;;  %s320_s11 = int_to_ptr.vmem [resolvable:$true] %s319_s11 }
  0x29   : > { %s317_s10 = sshll.u32 %s315_s9, 4  ;;  %p1603_p7 = pnand %p1139_p4, %p1577_p12  ;;  %s318_s10 = int_to_ptr.hbm [resolvable:$true] %s317_s10 }
  0x2a   : > { %s334_s5 = scalar_lea.hbm %s1752_s1, %s949_s24  ;;  %s326_s15 = sand.u32 1, %s1454_s30  }
  0x2b   : > { %s308_s29 = scalar_lea.sflag [#allocation3], %s307_s21  ;;  %s1284_s25 = sshra.s32 %s318_s10, 4  ;;  %s1285_s25 = int_to_ptr.hbm [resolvable:$true] %s1284_s25 }
  0x2c   : > { %s1286_s26 = scalar_lea.hbm %s1285_s25, 4  ;;  %p1288_p9 = pneg %p1603_p7 }
  0x2d   : > { %p1287_p8 = scmp.ne.s32.totalorder %s1285_s25, %s1286_s26  ;;  %s1291_s17 = scalar_lea.hbm %s1751_s0, 8 }
  0x2e   : > { %p1292_p12 = scmp.lt.s32.totalorder %s1285_s25, %s1751_s0  ;;  %p1293_p2 = scmp.lt.s32.totalorder %s1291_s17, %s1286_s26 }
  0x2f   : > { %p1289_p10 = pnand %p1288_p9, %p1287_p8 }
  0x30   : > { %p1294_p4 = por %p1293_p2, %p1292_p12 }
  0x31   : > { %p1290_p11 = pneg %p1289_p10 }
  0x33   : > { %p1295_p5 = pnand %p1294_p4, %p1290_p11 }
  0x35   : > { %1298 = shalt.err (!%p1295_p5)
}
  0x36   : > { %1125 = dma.hbm_to_vmem [thread:$0]  (!%p1603_p7), %s318_s10, 64, %s320_s11, %s308_s29  }
  0x37   : > { %s336_s21 = sshll.u32 %s334_s5, 4  ;;  %s330_s24 = scalar_lea.vmem [#allocation5], %s948_s23  ;;  %s337_s21 = int_to_ptr.hbm [resolvable:$true] %s336_s21 }
  0x38   : > { %s338_s16 = sshll.u32 %s330_s24, 4  ;;  %s327_s30 = scalar_lea.sflag [#allocation6], %s326_s15  ;;  %s339_s16 = int_to_ptr.vmem [resolvable:$true] %s338_s16 }
  0x39   : > { %s1314_s18 = sshra.s32 %s337_s21, 4  ;;  %s1321_s17 = scalar_lea.hbm %s1752_s1, 8  ;;  %s1315_s18 = int_to_ptr.hbm [resolvable:$true] %s1314_s18 }
  0x3a   : > { %s1316_s9 = scalar_lea.hbm %s1315_s18, 4  ;;  %p1322_p5 = scmp.lt.s32.totalorder %s1315_s18, %s1752_s1 }
  0x3b   : > { %p1317_p8 = scmp.ne.s32.totalorder %s1315_s18, %s1316_s9  ;;  %p1323_p11 = scmp.lt.s32.totalorder %s1321_s17, %s1316_s9 }
  0x3d   : > { %p1319_p10 = pnand %p1317_p8, %p1288_p9  ;;  %p1324_p2 = por %p1323_p11, %p1322_p5 }
  0x3f   : > { %p1320_p12 = pneg %p1319_p10 }
  0x41   : > { %p1325_p4 = pnand %p1324_p2, %p1320_p12 }
  0x43   : > { %1328 = shalt.err (!%p1325_p4)
}
  0x44   : > { %1128 = dma.hbm_to_vmem [thread:$0]  (!%p1603_p7), %s337_s21, 64, %s339_s16, %s327_s30  }
  0x45   : > { %347 = sbr.rel (%p1536_p3) target bundleno = 806 (0x326), region = 48  ;;  %s1638_s5 = sand.u32 (!%p1536_p3), 1, %s1446_s28  }
  0x46   : > { %s1641_s15 = sshll.u32 (!%p1536_p3), %s1638_s5, 2  ;;  %s350_s23 = scalar_lea.sflag (!%p1536_p3), [#allocation3], %s1638_s5 }
  0x47   : > { %s353_s10 = scalar_lea.vmem (!%p1536_p3), [#allocation2], %s1641_s15 }
  0x4a   : > { %1417 = dma.done.wait (%p1583_p13), %s350_s23, 64  }
  0x4b   : > { %1419 = vsyncadd (%p1583_p13), %s350_s23, 4294967232  ;;  %s359_s30 = sand.u32 1, %s1531_s12   ;;  %s363_s16 = scalar_lea.vmem [#allocation5], %s1641_s15 }
  0x4c   : > { %s360_s13 = scalar_lea.sflag [#allocation6], %s359_s30 }
  0x4d   : > { %1421 = dma.done.wait (%p1583_p13), %s360_s13, 64  }
  0x4e   : > { %1423 = vsyncadd (%p1583_p13), %s360_s13, 4294967232 }
  0x4f   : > { %1425 = dma.done.wait (%p53_p1), [#allocation6], 1024  }
  0x50   : > { %1427 = vsyncadd (%p53_p1), [#allocation6], 4294966272 }
  0x51   : > { %1429 = dma.done.wait (%p53_p1), [#allocation9], 2048  }
  0x52   : > { %1431 = vsyncadd (%p53_p1), [#allocation9], 4294965248  ;;  %v426_v0 = vlaneseq  ;;  %v1071_v1 = vld [vmem:[#allocation7 + $0x38] sm:$0xff]  ;;  %v1070_v3 = vld [vmem:[#allocation7 + $0x30] sm:$0xff]  ;;  %s414_s21 = scalar_lea.vmem [#allocation11], %s1641_s15  ;;  %s960_s24 = sshll.u32 %s1531_s12, 3 }
  0x53   : > { %505 = vmatpush.bf16.msra.mxu0 %v1071_v1  ;;  %v1666_v4 = vld [vmem:[%s363_s16] sm:$0xf]  ;;  %v1078_v8 = vld [vmem:[#allocation8 + $0x30] sm:$0xff]  ;;  %v1069_v9 = vld [vmem:[#allocation7 + $0x28] sm:$0xff]  ;;  %vm564_vm6 = vcmask 7168   ;;  %s1060_s18 = sshll.u32 %s1531_s12, 2 }
  0x54   : > { %v1664_v2 = vand.u32 127, %v426_v0  ;;  %v425_v5 = vunpack.c.l.bf16 %v1666_v4  ;;  %v1079_v6 = vld [vmem:[#allocation8 + $0x38] sm:$0xff]  ;;  %v1068_v11 = vld [vmem:[#allocation7 + $0x20] sm:$0xff]  ;;  %v1066_v13 = vld [vmem:[#allocation7 + $0x10] sm:$0xff]  ;;  %s769_s26 = scalar_lea.hbm %s1758_s7, %s1060_s18  ;;  %s771_s17 = sshll.u32 %s414_s21, 4  ;;  %s772_s17 = int_to_ptr.vmem [resolvable:$true] %s771_s17 }
  0x55   : > { %728 = vmatpush.bf16.msra.mxu2 %v1079_v6  ;;  %v1067_v12 = vld [vmem:[#allocation7 + $0x18] sm:$0xff]  ;;  %v1065_v14 = vld [vmem:[#allocation7 + $0x8] sm:$0xff]  ;;  %v1064_v15 = vld [vmem:[#allocation7] sm:$0xff]  ;;  %s773_s2 = sshll.u32 %s769_s26, 4  ;;  %s754_s29 = scalar_lea.sflag [#allocation4], %s1638_s5  ;;  %s774_s2 = int_to_ptr.hbm [resolvable:$true] %s773_s2 }
  0x56   : > { %vm428_vm0 = vcmp.lt.s32.totalorder %v1664_v2, 32  ;;  %v532_v7 = vmul.f32 0.5, %v425_v5  ;;  %v1676_v16 = vld [vmem:[%s353_s10] sm:$0xf]  ;;  %v1087_v17 = vld [vmem:[#allocation10 + $0x38] sm:$0xff]  ;;  %v1077_v18 = vld [vmem:[#allocation8 + $0x28] sm:$0xff] }
  0x57   : > { %506 = vmatpush.bf16.msra.mxu0 %v1070_v3  ;;  %667 = vmatpush.bf16.msra.mxu1 %v1087_v17  ;;  %v1086_v19 = vld [vmem:[#allocation10 + $0x30] sm:$0xff]  ;;  %v1076_v20 = vld [vmem:[#allocation8 + $0x20] sm:$0xff]  ;;  %v1085_v21 = vld [vmem:[#allocation10 + $0x28] sm:$0xff]  ;;  %v424_v55 = vunpack.c.l.bf16 %v1676_v16  ;;  %s1358_s23 = sshra.s32 %s774_s2, 4  ;;  %s1364_s16 = scalar_lea.hbm %s1758_s7, 8  ;;  %s1359_s23 = int_to_ptr.hbm [resolvable:$true] %s1358_s23 }
  0x58   : > { %v533_v10 = vsel %vm428_vm0, %v532_v7, -1e+30  ;;  %v1075_v22 = vld [vmem:[#allocation8 + $0x18] sm:$0xff]  ;;  %v1084_v23 = vld [vmem:[#allocation10 + $0x20] sm:$0xff]  ;;  %v1074_v24 = vld [vmem:[#allocation8 + $0x10] sm:$0xff]  ;;  %s1360_s10 = scalar_lea.hbm %s1359_s23, 4  ;;  %p1365_p7 = scmp.lt.s32.totalorder %s1359_s23, %s1758_s7 }
  0x59   : > { %534 = vmax.xlane.f32.xlu0 %v533_v10  ;;  %729 = vmatpush.bf16.msra.mxu2 %v1078_v8  ;;  %v1083_v25 = vld [vmem:[#allocation10 + $0x18] sm:$0xff]  ;;  %v1073_v26 = vld [vmem:[#allocation8 + $0x8] sm:$0xff]  ;;  %v1082_v29 = vld [vmem:[#allocation10 + $0x10] sm:$0xff]  ;;  %v575_v56 = vsub.f32 %v424_v55, %v425_v5  ;;  %p1361_p1 = scmp.ne.s32.totalorder %s1359_s23, %s1360_s10  ;;  %p1366_p9 = scmp.lt.s32.totalorder %s1364_s16, %s1360_s10 }
  0x5a   : > { %v1072_v31 = vld [vmem:[#allocation8] sm:$0xff]  ;;  %v1081_v32 = vld [vmem:[#allocation10 + $0x8] sm:$0xff]  ;;  %v1182_v35 = vld [vmem:[%s1754_s3] ss:$0 sm:$0xff] }
  0x5b   : > { %507 = vmatpush.bf16.msra.mxu0 %v1069_v9  ;;  %668 = vmatpush.bf16.msra.mxu1 %v1086_v19  ;;  %v1080_v33 = vld [vmem:[#allocation10] sm:$0xff]  ;;  %v1183_v48 = vld [vmem:[%s1757_s6] ss:$0 sm:$0xff]  ;;  %v576_v57 = vmul.f32 %v575_v56, %v575_v56  ;;  %p1362_p3 = pnand %p1361_p1, %p1587_p0  ;;  %p1367_p8 = por %p1366_p9, %p1365_p7 }
  0x5d   : > { %730 = vmatpush.bf16.msra.mxu2 %v1077_v18  ;;  %v1461_v18 = vmov 0.0   ;;  %p1363_p13 = pneg %p1362_p3 }
  0x5f   : > { %508 = vmatpush.bf16.msra.mxu0 %v1068_v11  ;;  %669 = vmatpush.bf16.msra.mxu1 %v1085_v21  ;;  %p1368_p10 = pnand %p1367_p8, %p1363_p13 }
  0x61   : > { %731 = vmatpush.bf16.msra.mxu2 %v1076_v20 }
  0x63   : > { %509 = vmatpush.bf16.msra.mxu0 %v1067_v12  ;;  %670 = vmatpush.bf16.msra.mxu1 %v1084_v23 }
  0x65   : > { %732 = vmatpush.bf16.msra.mxu2 %v1075_v22 }
  0x67   : > { %510 = vmatpush.bf16.msra.mxu0 %v1066_v13  ;;  %671 = vmatpush.bf16.msra.mxu1 %v1083_v25 }
  0x69   : > { %733 = vmatpush.bf16.msra.mxu2 %v1074_v24 }
  0x6b   : > { %511 = vmatpush.bf16.msra.mxu0 %v1065_v14  ;;  %672 = vmatpush.bf16.msra.mxu1 %v1082_v29 }
  0x6d   : > { %734 = vmatpush.bf16.msra.mxu2 %v1073_v26 }
  0x6f   : > { %512 = vmatpush.bf16.msra.mxu0 %v1064_v15  ;;  %673 = vmatpush.bf16.msra.mxu1 %v1081_v32  ;;  %v430_v15 = vshrl.u32 %v426_v0, 7 }
  0x71   : > { %735 = vmatpush.bf16.msra.mxu2 %v1072_v31 }
  0x72   : > { %513 = vmatmul.bf16.vlgmr.msra.gmra.mxu0 %v1676_v16  ;;  %v432_v16 = vstv %s960_s24 }
  0x73   : > { %674 = vmatpush.bf16.msra.mxu1 %v1080_v33  ;;  %v433_v17 = vadd.s32 %v432_v16, %v430_v15 }
  0x75   : > { %vm434_vm5 = vcmp.lt.s32.totalorder %v433_v17, 16 }
  0x76   : > { %675 = vmatmul.bf16.vlgmr.msra.gmra.mxu1 %v1666_v4  ;;  %v961_v19 = vsel %vm434_vm5, 1.0, %v1461_v18 }
  0xcc   : > { %v535_v27 = vpop.xlane.xlu0 %534 }
  0xcd   : > { %v1679_v28 = vsub.f32 %v533_v10, %v535_v27 }
  0xcf   : > { %v537_v30 = vmul.f32 1.442695, %v1679_v28 }
  0xd1   : > { %1184 = vpow2.f32 %v537_v30 }
  0xd7   : > { %v1185_v34 = vpop.eup %1184 }
  0xd8   : > { %539 = vadd.xlane.f32.xlu1 %v1185_v34 }
  0xef   : > { %v514_v36 = vpop.f32.mrf.mxu0 }
  0xf0   : > { %v515_v37 = vadd.f32 %v1182_v35, %v514_v36 }
  0xf2   : > { %v586_v38 = vpack.c.bf16 %v515_v37, %v515_v37  ;;  %v518_v39 = vmul.f32 0.5, %v515_v37 }
  0xf3   : > { %v676_v42 = vpop.f32.mrf.mxu1 }
  0xf4   : > { %736 = vmatmul.bf16.vlgmr.msra.gmra.mxu2 %v586_v38  ;;  %v521_v40 = vsel %vm428_vm0, %v518_v39, -1e+30 }
  0xf5   : > { %522 = vmax.xlane.f32.xlu0 %v521_v40 }
  0xf7   : > { %v516_v41 = vpop.f32.mrf.mxu0 }
  0xfb   : > { %v678_v43 = vpop.f32.mrf.mxu1 }
  0xfd   : > { %577 = vadd.xlane.f32.xlu0 %v576_v57 }
 0x14b   : > { %v540_v54 = vpop.xlane.xlu1 %539 }
 0x14c   : > { %vm549_vm1 = vweird.f32 %v540_v54  ;;  %v555_v63 = vand.u32 2147483648, %v540_v54  ;;  %v553_v2 = vand.u32 2147483647, %v540_v54 }
 0x14e   : > { %v556_v6 = vor.u32 1.1754944e-38, %v555_v63  ;;  %vm554_vm4 = vcmp.eq.f32.partialorder %v553_v2, 8.507059e+37 }
 0x168   : > { %v523_v44 = vpop.xlane.xlu0 %522 }
 0x169   : > { %v524_v45 = vsub.f32 %v521_v40, %v523_v44 }
 0x16b   : > { %v525_v46 = vmul.f32 1.442695, %v524_v45 }
 0x16d   : > { %1186 = vpow2.f32 %v525_v46 }
 0x16e   : > { %1188 = vrcp.f32 %v540_v54 }
 0x16f   : > { %1190 = vlog2.f32 %v540_v54 }
 0x173   : > { %v1187_v47 = vpop.eup %1186 }
 0x174   : > { %527 = vadd.xlane.f32.xlu1 %v1187_v47  ;;  %v1189_v58 = vpop.eup %1188 }
 0x175   : > { %v545_v59 = vmul.f32 %v1189_v58, %v540_v54  ;;  %vm550_vm2 = vweird.f32 %v1189_v58  ;;  %v1191_v3 = vpop.eup %1190 }
 0x176   : > { %vm551_vm3 = vmor %vm549_vm1, %vm550_vm2  ;;  %v542_v4 = vmul.f32 0.6931472, %v1191_v3 }
 0x177   : > { %v737_v49 = vpop.f32.mrf.mxu2  ;;  %v546_v60 = vsub.f32 1.0, %v545_v59 }
 0x178   : > { %v738_v50 = vadd.f32 %v737_v49, %v676_v42  ;;  %v543_v11 = vsub.f32 %v1679_v28, %v542_v4 }
 0x179   : > { %v547_v61 = vmul.f32 %v1189_v58, %v546_v60 }
 0x17a   : > { %v745_v51 = vadd.f32 %v1183_v48, %v738_v50 }
 0x17b   : > { %v548_v1 = vadd.f32 %v1189_v58, %v547_v61 }
 0x17c   : > { %v746_v52 = vpack.c.bf16 %v745_v51, %v745_v51 }
 0x17d   : > { %v552_v5 = vsel %vm551_vm3, %v1189_v58, %v548_v1 }
 0x17e   : > { %747 = vst [vmem:[%s414_s21] sm:$0xf] %v746_v52  ;;  %v557_v9 = vsel %vm554_vm4, %v556_v6, %v552_v5 }
 0x17f   : > { %v739_v53 = vpop.f32.mrf.mxu2  ;;  %v558_v12 = vmul.f32 %v1185_v34, %v557_v9 }
 0x1e7   : > { %v528_v62 = vpop.xlane.xlu1 %527 }
 0x1e8   : > { %1192 = vlog2.f32 %v528_v62 }
 0x1ee   : > { %v1193_v7 = vpop.eup %1192 }
 0x1ef   : > { %v530_v8 = vmul.f32 0.6931472, %v1193_v7 }
 0x1f1   : > { %v531_v10 = vsub.f32 %v524_v45, %v530_v8 }
 0x1f3   : > { %v559_v13 = vsub.f32 %v543_v11, %v531_v10 }
 0x1f5   : > { %v560_v14 = vmul.f32 %v559_v13, %v558_v12 }
 0x1f7   : > { %561 = vadd.xlane.f32.xlu2 %v560_v14 }
 0x26a   : > { %v562_v20 = vpop.xlane.xlu2 %561 }
 0x26b   : > { %v563_v21 = vmul.f32 %v961_v19, %v562_v20 }
 0x26d   : > { %v565_v22 = vsel %vm564_vm6, %v563_v21, 0.0 }
 0x26e   : > { %566 = vadd.xlane.f32.xlu2 %v565_v22 }
 0x26f   : > { %1371 = shalt.err (!%p1368_p10)
}
 0x270   : > { %1108 = dma.vmem_to_hbm [thread:$0]  (%p1587_p0), %s772_s17, 64, %s774_s2, %s754_s29   ;;  %v578_v0 = vpop.xlane.xlu0 %577  ;;  %vm748_vm7 = vcmp.eq.s32.totalorder %v430_v15, 0 }
 0x271   : > { %v579_v23 = vrot.slane %v578_v0, 4  ;;  %s959_s15 = sshll.u32 %s1638_s5, 1  ;;  %s1061_s14 = sshll.u32 %s1531_s12, 1 }
 0x272   : > { %s783_s24 = scalar_lea.hbm %s1759_s8, %s1061_s14  ;;  %s421_s18 = scalar_lea.vmem [#allocation12], %s959_s15 }
 0x273   : > { %v580_v24 = vadd.f32 %v579_v23, %v578_v0  ;;  %s785_s9 = sshll.u32 %s421_s18, 4  ;;  %s787_s25 = sshll.u32 %s783_s24, 4  ;;  %s786_s9 = int_to_ptr.vmem [resolvable:$true] %s785_s9  ;;  %s788_s25 = int_to_ptr.hbm [resolvable:$true] %s787_s25 }
 0x274   : > { %s759_s2 = scalar_lea.sflag [#allocation13], %s1638_s5  ;;  %s1386_s29 = sshra.s32 %s788_s25, 4  ;;  %s1387_s29 = int_to_ptr.hbm [resolvable:$true] %s1386_s29 }
 0x275   : > { %v581_v25 = vrot.slane %v580_v24, 2  ;;  %s1388_s12 = scalar_lea.hbm %s1387_s29, 2  ;;  %s1392_s30 = scalar_lea.hbm %s1759_s8, 4 }
 0x276   : > { %p1389_p12 = scmp.ne.s32.totalorder %s1387_s29, %s1388_s12  ;;  %p1393_p2 = scmp.lt.s32.totalorder %s1387_s29, %s1759_s8 }
 0x277   : > { %v582_v29 = vadd.f32 %v581_v25, %v580_v24  ;;  %p1394_p4 = scmp.lt.s32.totalorder %s1392_s30, %s1388_s12 }
 0x278   : > { %p1390_p5 = pnand %p1389_p12, %p1587_p0 }
 0x279   : > { %v583_v32 = vrot.slane %v582_v29, 1  ;;  %p1395_p1 = por %p1394_p4, %p1393_p2 }
 0x27a   : > { %p1391_p11 = pneg %p1390_p5 }
 0x27b   : > { %v584_v35 = vadd.f32 %v583_v32, %v582_v29 }
 0x27c   : > { %p1396_p3 = pnand %p1395_p1, %p1391_p11 }
 0x2e1   : > { %v567_v26 = vpop.xlane.xlu2 %566 }
 0x2e2   : > { %v568_v27 = vrot.slane %v567_v26, 4 }
 0x2e4   : > { %v569_v28 = vadd.f32 %v568_v27, %v567_v26 }
 0x2e6   : > { %v570_v30 = vrot.slane %v569_v28, 2 }
 0x2e8   : > { %v571_v31 = vadd.f32 %v570_v30, %v569_v28 }
 0x2ea   : > { %v572_v33 = vrot.slane %v571_v31, 1 }
 0x2ec   : > { %v573_v34 = vadd.f32 %v572_v33, %v571_v31 }
 0x2ee   : > { %1088 = vpush %v573_v34 }
 0x2ef   : > { %1090 = vpush %v584_v35 }
 0x31f   : > { %s1089_s26 = spop %1088 }
 0x320   : > { %v749_v36 = vstv %s1089_s26  ;;  %s1091_s17 = spop %1090 }
 0x321   : > { %v750_v37 = vstv %s1091_s17 }
 0x322   : > { %v751_v38 = vsel %vm748_vm7, %v749_v36, %v750_v37 }
 0x323   : > { %752 = vst [vmem:[%s421_s18] sm:$0x3] %v751_v38 }
 0x324   : > { %1399 = shalt.err (!%p1396_p3)
}
 0x325   : > { %1109 = dma.vmem_to_hbm [thread:$0]  (%p1587_p0), %s786_s9, 32, %s788_s25, %s759_s2  }
 0x326 PF: > { %s1781_s5 = sld [smem:[#allocation21_spill]]  ;;  %s799_s19 = sand.u32 1, %s1442_s27  }
 0x327   : > { %s800_s11 = scalar_lea.sflag [#allocation4], %s799_s19 }
 0x32c   : > { %p1782_p13 = scmp.ge.s32.totalorder %s1781_s5, 2 }
 0x32e   : > { %p1130_p7 = pnand %p1782_p13, %p1593_p6 }
 0x330   : > { %p1131_p9 = pneg %p1130_p7 }
 0x332   : > { %1433 = dma.done.wait (%p1131_p9), %s800_s11, 64  }
 0x333   : > { %1435 = vsyncadd (%p1131_p9), %s800_s11, 4294967232  ;;  %s810_s15 = scalar_lea.sflag [#allocation13], %s799_s19 }
 0x334   : > { %1437 = dma.done.wait (%p1131_p9), %s810_s15, 32  }
 0x335   : > { %1439 = vsyncadd (%p1131_p9), %s810_s15, 4294967264  ;;  %s1783_s30 = sld [smem:[#allocation22_spill]]  ;;  %s1786_s27 = smov %s1446_s28 }
 0x336   : > { %s1784_s14 = sld [smem:[#allocation20_spill]] }
 0x337   : > { %s1785_s29 = sld [smem:[#allocation23_spill]] }
 0x33b   : > { %p29_p0 = scmp.ge.s32.totalorder %s1783_s30, 4  }
 0x33c   : > { %s1787_s28 = smov %s1784_s14 }
 0x33d   :  { %31 = sbr.rel (!%p29_p0) target bundleno = 14 (0xe), region = 135 }
 0x342   :  { %816 = vsyncpa [#allocation3], 1 }
 0x343   :  { %818 = vsyncpa [#allocation3 + $0x1], 1 }
 0x344   :  { %819 = vsyncpa [#allocation6], 1 }
 0x345   :  { %821 = vsyncpa [#allocation6 + $0x1], 1 }
 0x346   :  { %822 = vsyncpa [#allocation9], 1 }
 0x347   :  { %823 = vsyncpa [#allocation4], 1 }
 0x348   :  { %825 = vsyncpa [#allocation4 + $0x1], 1 }
 0x349   :  { %826 = vsyncpa [#allocation13], 1 }
 0x34a   :  { %828 = vsyncpa [#allocation13 + $0x1], 1 }

// kernel: tpu_custom_call.1
= control target key start
LH: loop header
LB: loop body
LE: loop exit
PB: predicated region body
PF: predicated region fallthrough
CT: control target
= control target key end

     0   :  { %s1751_s0 = inlined_call_operand.hbm [shape: bf16[16,128], index: 0, kind: input, shape index: {}]   ;;  %s1752_s1 = inlined_call_operand.hbm [shape: bf16[16,128], index: 1, kind: input, shape index: {}]   ;;  %s1753_s2 = inlined_call_operand.hbm [shape: bf16[128,128], index: 2, kind: input, shape index: {}]   ;;  %s1754_s3 = inlined_call_operand.vmem [shape: f32[1,128], index: 3, kind: input, shape index: {}]   ;;  %s1755_s4 = inlined_call_operand.hbm [shape: bf16[128,128], index: 4, kind: input, shape index: {}]   ;;  %s1756_s5 = inlined_call_operand.hbm [shape: bf16[128,128], index: 5, kind: input, shape index: {}]   ;;  %s1757_s6 = inlined_call_operand.vmem [shape: f32[1,128], index: 6, kind: input, shape index: {}]   ;;  %s1758_s7 = inlined_call_operand.hbm [shape: bf16[16,128], index: 7, kind: output, shape index: {0}]   ;;  %s1759_s8 = inlined_call_operand.hbm [shape: f32[2,2,128], index: 8, kind: output, shape index: {1}]  }
   0x1   :  { %1764 = sst [smem:[#allocation24_spill]] %s1753_s2 }
   0x2   :  { %1765 = sst [smem:[#allocation25_spill]] %s1755_s4 }
   0x3   :  { %1766 = sst [smem:[#allocation26_spill]] %s1756_s5 }
   0x4   :  { %14 = vsyncpa [#allocation3], 0 }
   0x5   :  { %16 = vsyncpa [#allocation3 + $0x1], 0 }
   0x6   :  { %17 = vsyncpa [#allocation6], 0 }
   0x7   :  { %19 = vsyncpa [#allocation6 + $0x1], 0 }
   0x8   :  { %20 = vsyncpa [#allocation9], 0 }
   0x9   :  { %21 = vsyncpa [#allocation4], 0 }
   0xa   :  { %23 = vsyncpa [#allocation4 + $0x1], 0 }
   0xb   :  { %24 = vsyncpa [#allocation13], 0 }
   0xc   :  { %26 = vsyncpa [#allocation13 + $0x1], 0  ;;  %s1507_s27 = smov 0   ;;  %s1509_s28 = smov 0  }
   0xd   :  { %s1511_s29 = smov 0   ;;  %s1513_s30 = smov 0  }
   0xe LB: > { %1767 = sst [smem:[#allocation20_spill]] %s1450_s29  ;;  %s1531_s12 = sadd.s32 4294967295, %s1454_s30   ;;  %s1454_s30 = sphi %s1513_s30, %s1783_s30   ;;  %s1450_s29 = sphi %s1511_s29, %s1785_s29   ;;  %s1446_s28 = sphi %s1509_s28, %s1787_s28   ;;  %s1442_s27 = sphi %s1507_s27, %s1786_s27  }
   0xf   : > { %1768 = sst [smem:[#allocation21_spill]] %s1454_s30  ;;  %p943_p0 = scmp.ge.s32.totalorder %s1454_s30, 1 }
  0x10   : > { %s1769_s2 = sld [smem:[#allocation24_spill]]  ;;  %p53_p1 = scmp.eq.s32.totalorder %s1531_s12, 0 }
  0x11   : > { %p246_p2 = scmp.lt.s32.totalorder %s1454_s30, 3  ;;  %s1456_s14 = smov [#allocation7]  }
  0x12   : > { %s259_s15 = sshll.u32 %s1456_s14, 4  ;;  %s1771_s4 = sld [smem:[#allocation25_spill]]  ;;  %s260_s15 = int_to_ptr.vmem [resolvable:$true] %s259_s15 }
  0x13   : > { %p1536_p3 = pnand %p943_p0, %p246_p2  ;;  %s1773_s5 = sld [smem:[#allocation26_spill]] }
  0x14   : > { %s1457_s23 = smov [#allocation8]   ;;  %s1458_s25 = smov 64  }
  0x15   : > { %p1112_p4 = pneg %p1536_p3  ;;  %s276_s24 = sshll.u32 %s1457_s23, 4  ;;  %s277_s24 = int_to_ptr.vmem [resolvable:$true] %s276_s24 }
  0x16   : > { %s257_s11 = sshll.u32 %s1769_s2, 4  ;;  %s1459_s26 = smov 4   ;;  %s258_s11 = int_to_ptr.hbm [resolvable:$true] %s257_s11 }
  0x17   : > { %p1548_p6 = pnand %p1112_p4, %p53_p1  ;;  %s1460_s9 = smov [#allocation10]  }
  0x18   : > { %s274_s18 = sshll.u32 %s1771_s4, 4  ;;  %s290_s10 = sshll.u32 %s1460_s9, 4  ;;  %s275_s18 = int_to_ptr.hbm [resolvable:$true] %s274_s18  ;;  %s291_s10 = int_to_ptr.vmem [resolvable:$true] %s290_s10 }
  0x19   : > { %s288_s22 = sshll.u32 %s1773_s5, 4  ;;  %s942_s14 = sadd.s32 4294967294, %s1454_s30   ;;  %s289_s22 = int_to_ptr.hbm [resolvable:$true] %s288_s22 }
  0x1a   : > { %1115 = dma.hbm_to_vmem [thread:$0]  (!%p1548_p6), %s258_s11, 1024, %s260_s15, [#allocation6], %s1458_s25, %s1458_s25, %s1459_s26  }
  0x1b   : > { %1118 = dma.hbm_to_vmem [thread:$0]  (!%p1548_p6), %s275_s18, 1024, %s277_s24, [#allocation9], %s1458_s25, %s1458_s25, %s1459_s26  }
  0x1c   : > { %1121 = dma.hbm_to_vmem [thread:$0]  (!%p1548_p6), %s289_s22, 1024, %s291_s10, [#allocation9], %s1458_s25, %s1458_s25, %s1459_s26  }
  0x1d   : > { %s1563_s16 = sadd.s32 1, %s1454_s30   ;;  %s39_s17 = sadd.s32 1, %s1450_s29 }
  0x1e   : > { %1774 = sst [smem:[#allocation22_spill]] %s1563_s16  ;;  %s36_s11 = ssub.s32 %s1454_s30, %s1563_s16 }
  0x1f   : > { %p46_p7 = scmp.ne.s32.totalorder %s1450_s29, %s1446_s28  ;;  %p37_p8 = scmp.eq.s32.totalorder %s36_s11, 0 }
  0x20   : > { %p47_p9 = scmp.eq.s32.totalorder %s1454_s30, 0  ;;  %p52_p10 = scmp.ne.s32.totalorder %s1446_s28, %s1442_s27 }
  0x21   : > { %p207_p11 = scmp.eq.s32.totalorder %s1531_s12, 1  ;;  %p213_p2 = scmp.eq.s32.totalorder %s942_s14, 1 }
  0x22   : > { %s1575_s15 = scalar_select %p37_p8, %s1450_s29, %s39_s17  }
  0x23   : > { %p1577_p12 = por %p47_p9, %p46_p7  ;;  %p1583_p13 = por %p53_p1, %p52_p10 }
  0x24   : > { %1775 = sst [smem:[#allocation23_spill]] %s1575_s15  ;;  %p1587_p0 = por %p207_p11, %p46_p7 }
  0x25   : > { %p1139_p4 = scmp.lt.s32.totalorder %s1454_s30, 2  ;;  %s307_s21 = sand.u32 1, %s1450_s29  }
  0x26   : > { %p1593_p6 = por %p213_p2, %p52_p10  ;;  %s948_s23 = sshll.u32 %s307_s21, 2 }
  0x27   : > { %s949_s24 = sshll.u32 %s1454_s30, 2  ;;  %s311_s17 = scalar_lea.vmem [#allocation2], %s948_s23 }
  0x28   : > { %s315_s9 = scalar_lea.hbm %s1751_s0, %s949_s24  ;;  %s319_s11 = sshll.u32 %s311_s17, 4  ;;  %s320_s11 = int_to_ptr.vmem [resolvable:$true] %s319_s11 }
  0x29   : > { %s317_s10 = sshll.u32 %s315_s9, 4  ;;  %p1603_p7 = pnand %p1139_p4, %p1577_p12  ;;  %s318_s10 = int_to_ptr.hbm [resolvable:$true] %s317_s10 }
  0x2a   : > { %s334_s5 = scalar_lea.hbm %s1752_s1, %s949_s24  ;;  %s326_s15 = sand.u32 1, %s1454_s30  }
  0x2b   : > { %s308_s29 = scalar_lea.sflag [#allocation3], %s307_s21  ;;  %s1284_s25 = sshra.s32 %s318_s10, 4  ;;  %s1285_s25 = int_to_ptr.hbm [resolvable:$true] %s1284_s25 }
  0x2c   : > { %s1286_s26 = scalar_lea.hbm %s1285_s25, 4  ;;  %p1288_p9 = pneg %p1603_p7 }
  0x2d   : > { %p1287_p8 = scmp.ne.s32.totalorder %s1285_s25, %s1286_s26  ;;  %s1291_s17 = scalar_lea.hbm %s1751_s0, 8 }
  0x2e   : > { %p1292_p12 = scmp.lt.s32.totalorder %s1285_s25, %s1751_s0  ;;  %p1293_p2 = scmp.lt.s32.totalorder %s1291_s17, %s1286_s26 }
  0x2f   : > { %p1289_p10 = pnand %p1288_p9, %p1287_p8 }
  0x30   : > { %p1294_p4 = por %p1293_p2, %p1292_p12 }
  0x31   : > { %p1290_p11 = pneg %p1289_p10 }
  0x33   : > { %p1295_p5 = pnand %p1294_p4, %p1290_p11 }
  0x35   : > { %1298 = shalt.err (!%p1295_p5)
}
  0x36   : > { %1125 = dma.hbm_to_vmem [thread:$0]  (!%p1603_p7), %s318_s10, 64, %s320_s11, %s308_s29  }
  0x37   : > { %s336_s21 = sshll.u32 %s334_s5, 4  ;;  %s330_s24 = scalar_lea.vmem [#allocation5], %s948_s23  ;;  %s337_s21 = int_to_ptr.hbm [resolvable:$true] %s336_s21 }
  0x38   : > { %s338_s16 = sshll.u32 %s330_s24, 4  ;;  %s327_s30 = scalar_lea.sflag [#allocation6], %s326_s15  ;;  %s339_s16 = int_to_ptr.vmem [resolvable:$true] %s338_s16 }
  0x39   : > { %s1314_s18 = sshra.s32 %s337_s21, 4  ;;  %s1321_s17 = scalar_lea.hbm %s1752_s1, 8  ;;  %s1315_s18 = int_to_ptr.hbm [resolvable:$true] %s1314_s18 }
  0x3a   : > { %s1316_s9 = scalar_lea.hbm %s1315_s18, 4  ;;  %p1322_p5 = scmp.lt.s32.totalorder %s1315_s18, %s1752_s1 }
  0x3b   : > { %p1317_p8 = scmp.ne.s32.totalorder %s1315_s18, %s1316_s9  ;;  %p1323_p11 = scmp.lt.s32.totalorder %s1321_s17, %s1316_s9 }
  0x3d   : > { %p1319_p10 = pnand %p1317_p8, %p1288_p9  ;;  %p1324_p2 = por %p1323_p11, %p1322_p5 }
  0x3f   : > { %p1320_p12 = pneg %p1319_p10 }
  0x41   : > { %p1325_p4 = pnand %p1324_p2, %p1320_p12 }
  0x43   : > { %1328 = shalt.err (!%p1325_p4)
}
  0x44   : > { %1128 = dma.hbm_to_vmem [thread:$0]  (!%p1603_p7), %s337_s21, 64, %s339_s16, %s327_s30  }
  0x45   : > { %347 = sbr.rel (%p1536_p3) target bundleno = 806 (0x326), region = 48  ;;  %s1638_s5 = sand.u32 (!%p1536_p3), 1, %s1446_s28  }
  0x46   : > { %s1641_s15 = sshll.u32 (!%p1536_p3), %s1638_s5, 2  ;;  %s350_s23 = scalar_lea.sflag (!%p1536_p3), [#allocation3], %s1638_s5 }
  0x47   : > { %s353_s10 = scalar_lea.vmem (!%p1536_p3), [#allocation2], %s1641_s15 }
  0x4a   : > { %1417 = dma.done.wait (%p1583_p13), %s350_s23, 64  }
  0x4b   : > { %1419 = vsyncadd (%p1583_p13), %s350_s23, 4294967232  ;;  %s359_s30 = sand.u32 1, %s1531_s12   ;;  %s363_s16 = scalar_lea.vmem [#allocation5], %s1641_s15 }
  0x4c   : > { %s360_s13 = scalar_lea.sflag [#allocation6], %s359_s30 }
  0x4d   : > { %1421 = dma.done.wait (%p1583_p13), %s360_s13, 64  }
  0x4e   : > { %1423 = vsyncadd (%p1583_p13), %s360_s13, 4294967232 }
  0x4f   : > { %1425 = dma.done.wait (%p53_p1), [#allocation6], 1024  }
  0x50   : > { %1427 = vsyncadd (%p53_p1), [#allocation6], 4294966272 }
  0x51   : > { %1429 = dma.done.wait (%p53_p1), [#allocation9], 2048  }
  0x52   : > { %1431 = vsyncadd (%p53_p1), [#allocation9], 4294965248  ;;  %v426_v0 = vlaneseq  ;;  %v1071_v1 = vld [vmem:[#allocation7 + $0x38] sm:$0xff]  ;;  %v1070_v3 = vld [vmem:[#allocation7 + $0x30] sm:$0xff]  ;;  %s414_s21 = scalar_lea.vmem [#allocation11], %s1641_s15  ;;  %s960_s24 = sshll.u32 %s1531_s12, 3 }
  0x53   : > { %505 = vmatpush.bf16.msra.mxu0 %v1071_v1  ;;  %v1666_v4 = vld [vmem:[%s363_s16] sm:$0xf]  ;;  %v1078_v8 = vld [vmem:[#allocation8 + $0x30] sm:$0xff]  ;;  %v1069_v9 = vld [vmem:[#allocation7 + $0x28] sm:$0xff]  ;;  %vm564_vm6 = vcmask 7168   ;;  %s1060_s18 = sshll.u32 %s1531_s12, 2 }
  0x54   : > { %v1664_v2 = vand.u32 127, %v426_v0  ;;  %v425_v5 = vunpack.c.l.bf16 %v1666_v4  ;;  %v1079_v6 = vld [vmem:[#allocation8 + $0x38] sm:$0xff]  ;;  %v1068_v11 = vld [vmem:[#allocation7 + $0x20] sm:$0xff]  ;;  %v1066_v13 = vld [vmem:[#allocation7 + $0x10] sm:$0xff]  ;;  %s769_s26 = scalar_lea.hbm %s1758_s7, %s1060_s18  ;;  %s771_s17 = sshll.u32 %s414_s21, 4  ;;  %s772_s17 = int_to_ptr.vmem [resolvable:$true] %s771_s17 }
  0x55   : > { %728 = vmatpush.bf16.msra.mxu2 %v1079_v6  ;;  %v1067_v12 = vld [vmem:[#allocation7 + $0x18] sm:$0xff]  ;;  %v1065_v14 = vld [vmem:[#allocation7 + $0x8] sm:$0xff]  ;;  %v1064_v15 = vld [vmem:[#allocation7] sm:$0xff]  ;;  %s773_s2 = sshll.u32 %s769_s26, 4  ;;  %s754_s29 = scalar_lea.sflag [#allocation4], %s1638_s5  ;;  %s774_s2 = int_to_ptr.hbm [resolvable:$true] %s773_s2 }
  0x56   : > { %vm428_vm0 = vcmp.lt.s32.totalorder %v1664_v2, 32  ;;  %v532_v7 = vmul.f32 0.5, %v425_v5  ;;  %v1676_v16 = vld [vmem:[%s353_s10] sm:$0xf]  ;;  %v1087_v17 = vld [vmem:[#allocation10 + $0x38] sm:$0xff]  ;;  %v1077_v18 = vld [vmem:[#allocation8 + $0x28] sm:$0xff] }
  0x57   : > { %506 = vmatpush.bf16.msra.mxu0 %v1070_v3  ;;  %667 = vmatpush.bf16.msra.mxu1 %v1087_v17  ;;  %v1086_v19 = vld [vmem:[#allocation10 + $0x30] sm:$0xff]  ;;  %v1076_v20 = vld [vmem:[#allocation8 + $0x20] sm:$0xff]  ;;  %v1085_v21 = vld [vmem:[#allocation10 + $0x28] sm:$0xff]  ;;  %v424_v55 = vunpack.c.l.bf16 %v1676_v16  ;;  %s1358_s23 = sshra.s32 %s774_s2, 4  ;;  %s1364_s16 = scalar_lea.hbm %s1758_s7, 8  ;;  %s1359_s23 = int_to_ptr.hbm [resolvable:$true] %s1358_s23 }
  0x58   : > { %v533_v10 = vsel %vm428_vm0, %v532_v7, -1e+30  ;;  %v1075_v22 = vld [vmem:[#allocation8 + $0x18] sm:$0xff]  ;;  %v1084_v23 = vld [vmem:[#allocation10 + $0x20] sm:$0xff]  ;;  %v1074_v24 = vld [vmem:[#allocation8 + $0x10] sm:$0xff]  ;;  %s1360_s10 = scalar_lea.hbm %s1359_s23, 4  ;;  %p1365_p7 = scmp.lt.s32.totalorder %s1359_s23, %s1758_s7 }
  0x59   : > { %534 = vmax.xlane.f32.xlu0 %v533_v10  ;;  %729 = vmatpush.bf16.msra.mxu2 %v1078_v8  ;;  %v1083_v25 = vld [vmem:[#allocation10 + $0x18] sm:$0xff]  ;;  %v1073_v26 = vld [vmem:[#allocation8 + $0x8] sm:$0xff]  ;;  %v1082_v29 = vld [vmem:[#allocation10 + $0x10] sm:$0xff]  ;;  %v575_v56 = vsub.f32 %v424_v55, %v425_v5  ;;  %p1361_p1 = scmp.ne.s32.totalorder %s1359_s23, %s1360_s10  ;;  %p1366_p9 = scmp.lt.s32.totalorder %s1364_s16, %s1360_s10 }
  0x5a   : > { %v1072_v31 = vld [vmem:[#allocation8] sm:$0xff]  ;;  %v1081_v32 = vld [vmem:[#allocation10 + $0x8] sm:$0xff]  ;;  %v1182_v35 = vld [vmem:[%s1754_s3] ss:$0 sm:$0xff] }
  0x5b   : > { %507 = vmatpush.bf16.msra.mxu0 %v1069_v9  ;;  %668 = vmatpush.bf16.msra.mxu1 %v1086_v19  ;;  %v1080_v33 = vld [vmem:[#allocation10] sm:$0xff]  ;;  %v1183_v48 = vld [vmem:[%s1757_s6] ss:$0 sm:$0xff]  ;;  %v576_v57 = vmul.f32 %v575_v56, %v575_v56  ;;  %p1362_p3 = pnand %p1361_p1, %p1587_p0  ;;  %p1367_p8 = por %p1366_p9, %p1365_p7 }
  0x5d   : > { %730 = vmatpush.bf16.msra.mxu2 %v1077_v18  ;;  %v1461_v18 = vmov 0.0   ;;  %p1363_p13 = pneg %p1362_p3 }
  0x5f   : > { %508 = vmatpush.bf16.msra.mxu0 %v1068_v11  ;;  %669 = vmatpush.bf16.msra.mxu1 %v1085_v21  ;;  %p1368_p10 = pnand %p1367_p8, %p1363_p13 }
  0x61   : > { %731 = vmatpush.bf16.msra.mxu2 %v1076_v20 }
  0x63   : > { %509 = vmatpush.bf16.msra.mxu0 %v1067_v12  ;;  %670 = vmatpush.bf16.msra.mxu1 %v1084_v23 }
  0x65   : > { %732 = vmatpush.bf16.msra.mxu2 %v1075_v22 }
  0x67   : > { %510 = vmatpush.bf16.msra.mxu0 %v1066_v13  ;;  %671 = vmatpush.bf16.msra.mxu1 %v1083_v25 }
  0x69   : > { %733 = vmatpush.bf16.msra.mxu2 %v1074_v24 }
  0x6b   : > { %511 = vmatpush.bf16.msra.mxu0 %v1065_v14  ;;  %672 = vmatpush.bf16.msra.mxu1 %v1082_v29 }
  0x6d   : > { %734 = vmatpush.bf16.msra.mxu2 %v1073_v26 }
  0x6f   : > { %512 = vmatpush.bf16.msra.mxu0 %v1064_v15  ;;  %673 = vmatpush.bf16.msra.mxu1 %v1081_v32  ;;  %v430_v15 = vshrl.u32 %v426_v0, 7 }
  0x71   : > { %735 = vmatpush.bf16.msra.mxu2 %v1072_v31 }
  0x72   : > { %513 = vmatmul.bf16.vlgmr.msra.gmra.mxu0 %v1676_v16  ;;  %v432_v16 = vstv %s960_s24 }
  0x73   : > { %674 = vmatpush.bf16.msra.mxu1 %v1080_v33  ;;  %v433_v17 = vadd.s32 %v432_v16, %v430_v15 }
  0x75   : > { %vm434_vm5 = vcmp.lt.s32.totalorder %v433_v17, 16 }
  0x76   : > { %675 = vmatmul.bf16.vlgmr.msra.gmra.mxu1 %v1666_v4  ;;  %v961_v19 = vsel %vm434_vm5, 1.0, %v1461_v18 }
  0xcc   : > { %v535_v27 = vpop.xlane.xlu0 %534 }
  0xcd   : > { %v1679_v28 = vsub.f32 %v533_v10, %v535_v27 }
  0xcf   : > { %v537_v30 = vmul.f32 1.442695, %v1679_v28 }
  0xd1   : > { %1184 = vpow2.f32 %v537_v30 }
  0xd7   : > { %v1185_v34 = vpop.eup %1184 }
  0xd8   : > { %539 = vadd.xlane.f32.xlu1 %v1185_v34 }
  0xef   : > { %v514_v36 = vpop.f32.mrf.mxu0 }
  0xf0   : > { %v515_v37 = vadd.f32 %v1182_v35, %v514_v36 }
  0xf2   : > { %v586_v38 = vpack.c.bf16 %v515_v37, %v515_v37  ;;  %v518_v39 = vmul.f32 0.5, %v515_v37 }
  0xf3   : > { %v676_v42 = vpop.f32.mrf.mxu1 }
  0xf4   : > { %736 = vmatmul.bf16.vlgmr.msra.gmra.mxu2 %v586_v38  ;;  %v521_v40 = vsel %vm428_vm0, %v518_v39, -1e+30 }
  0xf5   : > { %522 = vmax.xlane.f32.xlu0 %v521_v40 }
  0xf7   : > { %v516_v41 = vpop.f32.mrf.mxu0 }
  0xfb   : > { %v678_v43 = vpop.f32.mrf.mxu1 }
  0xfd   : > { %577 = vadd.xlane.f32.xlu0 %v576_v57 }
 0x14b   : > { %v540_v54 = vpop.xlane.xlu1 %539 }
 0x14c   : > { %vm549_vm1 = vweird.f32 %v540_v54  ;;  %v555_v63 = vand.u32 2147483648, %v540_v54  ;;  %v553_v2 = vand.u32 2147483647, %v540_v54 }
 0x14e   : > { %v556_v6 = vor.u32 1.1754944e-38, %v555_v63  ;;  %vm554_vm4 = vcmp.eq.f32.partialorder %v553_v2, 8.507059e+37 }
 0x168   : > { %v523_v44 = vpop.xlane.xlu0 %522 }
 0x169   : > { %v524_v45 = vsub.f32 %v521_v40, %v523_v44 }
 0x16b   : > { %v525_v46 = vmul.f32 1.442695, %v524_v45 }
 0x16d   : > { %1186 = vpow2.f32 %v525_v46 }
 0x16e   : > { %1188 = vrcp.f32 %v540_v54 }
 0x16f   : > { %1190 = vlog2.f32 %v540_v54 }
 0x173   : > { %v1187_v47 = vpop.eup %1186 }
 0x174   : > { %527 = vadd.xlane.f32.xlu1 %v1187_v47  ;;  %v1189_v58 = vpop.eup %1188 }
 0x175   : > { %v545_v59 = vmul.f32 %v1189_v58, %v540_v54  ;;  %vm550_vm2 = vweird.f32 %v1189_v58  ;;  %v1191_v3 = vpop.eup %1190 }
 0x176   : > { %vm551_vm3 = vmor %vm549_vm1, %vm550_vm2  ;;  %v542_v4 = vmul.f32 0.6931472, %v1191_v3 }
 0x177   : > { %v737_v49 = vpop.f32.mrf.mxu2  ;;  %v546_v60 = vsub.f32 1.0, %v545_v59 }
 0x178   : > { %v738_v50 = vadd.f32 %v737_v49, %v676_v42  ;;  %v543_v11 = vsub.f32 %v1679_v28, %v542_v4 }
 0x179   : > { %v547_v61 = vmul.f32 %v1189_v58, %v546_v60 }
 0x17a   : > { %v745_v51 = vadd.f32 %v1183_v48, %v738_v50 }
 0x17b   : > { %v548_v1 = vadd.f32 %v1189_v58, %v547_v61 }
 0x17c   : > { %v746_v52 = vpack.c.bf16 %v745_v51, %v745_v51 }
 0x17d   : > { %v552_v5 = vsel %vm551_vm3, %v1189_v58, %v548_v1 }
 0x17e   : > { %747 = vst [vmem:[%s414_s21] sm:$0xf] %v746_v52  ;;  %v557_v9 = vsel %vm554_vm4, %v556_v6, %v552_v5 }
 0x17f   : > { %v739_v53 = vpop.f32.mrf.mxu2  ;;  %v558_v12 = vmul.f32 %v1185_v34, %v557_v9 }
 0x1e7   : > { %v528_v62 = vpop.xlane.xlu1 %527 }
 0x1e8   : > { %1192 = vlog2.f32 %v528_v62 }
 0x1ee   : > { %v1193_v7 = vpop.eup %1192 }
 0x1ef   : > { %v530_v8 = vmul.f32 0.6931472, %v1193_v7 }
 0x1f1   : > { %v531_v10 = vsub.f32 %v524_v45, %v530_v8 }
 0x1f3   : > { %v559_v13 = vsub.f32 %v543_v11, %v531_v10 }
 0x1f5   : > { %v560_v14 = vmul.f32 %v559_v13, %v558_v12 }
 0x1f7   : > { %561 = vadd.xlane.f32.xlu2 %v560_v14 }
 0x26a   : > { %v562_v20 = vpop.xlane.xlu2 %561 }
 0x26b   : > { %v563_v21 = vmul.f32 %v961_v19, %v562_v20 }
 0x26d   : > { %v565_v22 = vsel %vm564_vm6, %v563_v21, 0.0 }
 0x26e   : > { %566 = vadd.xlane.f32.xlu2 %v565_v22 }
 0x26f   : > { %1371 = shalt.err (!%p1368_p10)
}
 0x270   : > { %1108 = dma.vmem_to_hbm [thread:$0]  (%p1587_p0), %s772_s17, 64, %s774_s2, %s754_s29   ;;  %v578_v0 = vpop.xlane.xlu0 %577  ;;  %vm748_vm7 = vcmp.eq.s32.totalorder %v430_v15, 0 }
 0x271   : > { %v579_v23 = vrot.slane %v578_v0, 4  ;;  %s959_s15 = sshll.u32 %s1638_s5, 1  ;;  %s1061_s14 = sshll.u32 %s1531_s12, 1 }
 0x272   : > { %s783_s24 = scalar_lea.hbm %s1759_s8, %s1061_s14  ;;  %s421_s18 = scalar_lea.vmem [#allocation12], %s959_s15 }
 0x273   : > { %v580_v24 = vadd.f32 %v579_v23, %v578_v0  ;;  %s785_s9 = sshll.u32 %s421_s18, 4  ;;  %s787_s25 = sshll.u32 %s783_s24, 4  ;;  %s786_s9 = int_to_ptr.vmem [resolvable:$true] %s785_s9  ;;  %s788_s25 = int_to_ptr.hbm [resolvable:$true] %s787_s25 }
 0x274   : > { %s759_s2 = scalar_lea.sflag [#allocation13], %s1638_s5  ;;  %s1386_s29 = sshra.s32 %s788_s25, 4  ;;  %s1387_s29 = int_to_ptr.hbm [resolvable:$true] %s1386_s29 }
 0x275   : > { %v581_v25 = vrot.slane %v580_v24, 2  ;;  %s1388_s12 = scalar_lea.hbm %s1387_s29, 2  ;;  %s1392_s30 = scalar_lea.hbm %s1759_s8, 4 }
 0x276   : > { %p1389_p12 = scmp.ne.s32.totalorder %s1387_s29, %s1388_s12  ;;  %p1393_p2 = scmp.lt.s32.totalorder %s1387_s29, %s1759_s8 }
 0x277   : > { %v582_v29 = vadd.f32 %v581_v25, %v580_v24  ;;  %p1394_p4 = scmp.lt.s32.totalorder %s1392_s30, %s1388_s12 }
 0x278   : > { %p1390_p5 = pnand %p1389_p12, %p1587_p0 }
 0x279   : > { %v583_v32 = vrot.slane %v582_v29, 1  ;;  %p1395_p1 = por %p1394_p4, %p1393_p2 }
 0x27a   : > { %p1391_p11 = pneg %p1390_p5 }
 0x27b   : > { %v584_v35 = vadd.f32 %v583_v32, %v582_v29 }
 0x27c   : > { %p1396_p3 = pnand %p1395_p1, %p1391_p11 }
 0x2e1   : > { %v567_v26 = vpop.xlane.xlu2 %566 }
 0x2e2   : > { %v568_v27 = vrot.slane %v567_v26, 4 }
 0x2e4   : > { %v569_v28 = vadd.f32 %v568_v27, %v567_v26 }
 0x2e6   : > { %v570_v30 = vrot.slane %v569_v28, 2 }
 0x2e8   : > { %v571_v31 = vadd.f32 %v570_v30, %v569_v28 }
 0x2ea   : > { %v572_v33 = vrot.slane %v571_v31, 1 }
 0x2ec   : > { %v573_v34 = vadd.f32 %v572_v33, %v571_v31 }
 0x2ee   : > { %1088 = vpush %v573_v34 }
 0x2ef   : > { %1090 = vpush %v584_v35 }
 0x31f   : > { %s1089_s26 = spop %1088 }
 0x320   : > { %v749_v36 = vstv %s1089_s26  ;;  %s1091_s17 = spop %1090 }
 0x321   : > { %v750_v37 = vstv %s1091_s17 }
 0x322   : > { %v751_v38 = vsel %vm748_vm7, %v749_v36, %v750_v37 }
 0x323   : > { %752 = vst [vmem:[%s421_s18] sm:$0x3] %v751_v38 }
 0x324   : > { %1399 = shalt.err (!%p1396_p3)
}
 0x325   : > { %1109 = dma.vmem_to_hbm [thread:$0]  (%p1587_p0), %s786_s9, 32, %s788_s25, %s759_s2  }
 0x326 PF: > { %s1781_s5 = sld [smem:[#allocation21_spill]]  ;;  %s799_s19 = sand.u32 1, %s1442_s27  }
 0x327   : > { %s800_s11 = scalar_lea.sflag [#allocation4], %s799_s19 }
 0x32c   : > { %p1782_p13 = scmp.ge.s32.totalorder %s1781_s5, 2 }
 0x32e   : > { %p1130_p7 = pnand %p1782_p13, %p1593_p6 }
 0x330   : > { %p1131_p9 = pneg %p1130_p7 }
 0x332   : > { %1433 = dma.done.wait (%p1131_p9), %s800_s11, 64  }
 0x333   : > { %1435 = vsyncadd (%p1131_p9), %s800_s11, 4294967232  ;;  %s810_s15 = scalar_lea.sflag [#allocation13], %s799_s19 }
 0x334   : > { %1437 = dma.done.wait (%p1131_p9), %s810_s15, 32  }
 0x335   : > { %1439 = vsyncadd (%p1131_p9), %s810_s15, 4294967264  ;;  %s1783_s30 = sld [smem:[#allocation22_spill]]  ;;  %s1786_s27 = smov %s1446_s28 }
 0x336   : > { %s1784_s14 = sld [smem:[#allocation20_spill]] }
 0x337   : > { %s1785_s29 = sld [smem:[#allocation23_spill]] }
 0x33b   : > { %p29_p0 = scmp.ge.s32.totalorder %s1783_s30, 4  }
 0x33c   : > { %s1787_s28 = smov %s1784_s14 }
 0x33d   :  { %31 = sbr.rel (!%p29_p0) target bundleno = 14 (0xe), region = 135 }
 0x342   :  { %816 = vsyncpa [#allocation3], 1 }
 0x343   :  { %818 = vsyncpa [#allocation3 + $0x1], 1 }
 0x344   :  { %819 = vsyncpa [#allocation6], 1 }
 0x345   :  { %821 = vsyncpa [#allocation6 + $0x1], 1 }
 0x346   :  { %822 = vsyncpa [#allocation9], 1 }
 0x347   :  { %823 = vsyncpa [#allocation4], 1 }
 0x348   :  { %825 = vsyncpa [#allocation4 + $0x1], 1 }
 0x349   :  { %826 = vsyncpa [#allocation13], 1 }
 0x34a   :  { %828 = vsyncpa [#allocation13 + $0x1], 1 }

</bundles_post_ra>
